<compile_context>
chip_gen: v6e
topology: v6e:2x2x1
jax: 0.10.0
libtpu: 0.0.40
codegen_flags: <defaults>
</compile_context>

<pallas_src>
import functools

import jax
import jax.numpy as jnp
from jax.experimental import pallas as pl
from jax.experimental.pallas import tpu as pltpu


def _round_up(x: int, m: int) -> int:
    return (x + m - 1) // m * m


def _make_bilinear_kernel(activation):
    """Kernel over one batch tile; full bilinear contraction + activation fused."""

    def kernel(x1_ref, x2_ref, w2_ref, tmat_ref, rmat_ref, b_ref, o_ref):
        x1 = x1_ref[...]                      # (TN, I)  node features, f32
        x2 = x2_ref[...]                      # (TN, J)  edge features, f32

        # One lane-dense contraction over i on the MXU (bf16 in, f32 accumulate).
        m = jnp.dot(x1.astype(jnp.bfloat16), w2_ref[...],
                    preferred_element_type=jnp.float32)                        # (TN, O*J)
        # Replicate x2 into each of the O output groups via the MXU. tmat is 0/1 (exact in
        # bf16); x2 picks up one bf16 rounding -- same as what DEFAULT TPU matmul precision
        # did implicitly before, but now explicit and guaranteed single-pass.
        x2r = jnp.dot(x2.astype(jnp.bfloat16), tmat_ref[...],
                      preferred_element_type=jnp.float32)                      # (TN, O*J)
        p = m * x2r                                                            # VPU, f32
        # Reduce over j on the MXU with a 0/1 block-diagonal matrix -> lane-contiguous (TN, O).
        y = jnp.dot(p.astype(jnp.bfloat16), rmat_ref[...],
                    preferred_element_type=jnp.float32)                        # (TN, O)
        y = y + b_ref[...]

        if activation == "relu":
            y = jnp.maximum(y, 0.0)
        elif activation == "softplus":
            y = jax.nn.softplus(y)
        elif activation == "sigmoid":
            y = jax.nn.sigmoid(y)
        elif activation == "softmax":
            # torch nn.Softmax(dim=1): softmax over out_feats per row; the full out dim
            # lives in this block so it fuses cleanly. Exact divide (rows sum to ~1).
            mx = jnp.max(y, axis=1, keepdims=True)
            e = jnp.exp(y - mx)
            y = e / jnp.sum(e, axis=1, keepdims=True)
        # activation == None: identity

        # TODO(synk): the output block is only O lanes wide (masked vst + strided VMEM-side
        # DMA, ~22% of HBM bytes). A (tn, O) -> (tn//8, 8*O) in-kernel repack would make the
        # store lane-dense, but relies on a sublane->lane relayout whose Mosaic lowering is
        # not guaranteed at these shapes; left out to keep the kernel robust.
        o_ref[...] = y.astype(o_ref.dtype)

    return kernel


def _pick_batch_tile(n: int, tile_n: int) -> int:
    """Per-step row count: as large as tile_n, a multiple of 8, and chosen so the grid
    keeps >=2 steps when there is enough work (v7x dual TensorCores / megacore)."""
    num_tiles = max(1, -(-n // tile_n))           # cdiv
    if num_tiles == 1 and n >= 1024:
        num_tiles = 2
    return _round_up(-(-n // num_tiles), 8)


@functools.partial(jax.jit, static_argnames=("activation", "tile_n", "min_pallas_rows"))
def bilinear_block(node_inputs, edge_inputs, weight, bias, *,
                   activation=None, tile_n=4096, min_pallas_rows=512):
    n, node_in = node_inputs.shape
    n2, edge_in = edge_inputs.shape
    assert n == n2
    out_feats = weight.shape[0]
    assert weight.shape == (out_feats, node_in, edge_in)
    I, J, O = node_in, edge_in, out_feats

    # Small-batch fallback: kernel launch + operand prep dominate below a few hundred rows;
    # XLA's fused einsum is faster there (and exactly f32).
    if n < min_pallas_rows:
        return bilinear_ref(node_inputs, edge_inputs, weight, bias, activation)

    # ---- Grid-invariant operands, built once in the wrapper (never reshaped in-kernel) ----
    # W2[i, o*J + j] = W[o, i, j]; bf16 for a single MXU pass (accumulation stays f32).
    w2 = jnp.transpose(weight, (1, 0, 2)).reshape(I, O * J).astype(jnp.bfloat16)
    # tmat[j, o*J + j'] = (j == j')  -> x2 @ tmat replicates x2 across the O output groups.
    tmat = jnp.tile(jnp.eye(J, dtype=jnp.bfloat16), (1, O))            # (J, O*J), 0/1 exact
    # rmat[o*J + j, o'] = (o == o')  -> p @ rmat sums over j per output feature.
    rmat = jnp.repeat(jnp.eye(O, dtype=jnp.bfloat16), J, axis=0)       # (O*J, O), 0/1 exact
    bias2 = bias.reshape(1, O).astype(jnp.float32)

    # ---- Batch tiling: big tiles amortize per-step overhead; pl.cdiv grid with a partial
    # last tile instead of a wrapper-side full-array pad copy (which was an extra full HBM
    # read+write of both inputs). Rows past n in a partial tile are never written back.
    tn = _pick_batch_tile(n, int(tile_n))
    grid = (pl.cdiv(n, tn),)

    kernel = _make_bilinear_kernel(activation)
    out = pl.pallas_call(
        kernel,
        out_shape=jax.ShapeDtypeStruct((n, O), node_inputs.dtype),
        grid_spec=pl.GridSpec(
            grid=grid,
            in_specs=[
                pl.BlockSpec((tn, I), lambda i: (i, 0)),
                pl.BlockSpec((tn, J), lambda i: (i, 0)),
                # Loop-invariant operands: constant index_map => fetched once, held resident
                # in VMEM across all grid steps (<100 KB total in bf16).
                pl.BlockSpec((I, O * J), lambda i: (0, 0)),
                pl.BlockSpec((J, O * J), lambda i: (0, 0)),
                pl.BlockSpec((O * J, O), lambda i: (0, 0)),
                pl.BlockSpec((1, O), lambda i: (0, 0)),
            ],
            out_specs=pl.BlockSpec((tn, O), lambda i: (i, 0)),
        ),
        compiler_params=pltpu.CompilerParams(
            # Batch tiles are independent -> shard across TensorCores (megacore / v7x).
            dimension_semantics=("parallel",),
        ),
    )(node_inputs, edge_inputs, w2, tmat, rmat, bias2)
    return out


def bilinear_ref(x1, x2, w, b, activation=None):
    """Pure-JAX f32 reference matching torch semantics."""
    y = jnp.einsum("ni,oij,nj->no", x1, w, x2) + b[None, :]
    if activation == "relu":
        y = jnp.maximum(y, 0.0)
    elif activation == "softplus":
        y = jax.nn.softplus(y)
    elif activation == "sigmoid":
        y = jax.nn.sigmoid(y)
    elif activation == "softmax":
        y = jax.nn.softmax(y, axis=1)
    return y


if __name__ == "__main__":
    key = jax.random.PRNGKey(0)
    k1, k2 = jax.random.split(key, 2)

    # Small feature shapes consistent with the module's forward.
    node_in, edge_in, out_feats = 32, 24, 16

    # Same init scale as torch.nn.Bilinear: U(-1/sqrt(in1), 1/sqrt(in1)).
    bound = 1.0 / (node_in ** 0.5)
    weight = jax.random.uniform(k1, (out_feats, node_in, edge_in), jnp.float32, -bound, bound)
    bias = jax.random.uniform(k2, (out_feats,), jnp.float32, -bound, bound)

    def check(n, **kw):
        kn, ke = jax.random.split(jax.random.fold_in(key, n))
        node_inputs = jax.random.normal(kn, (n, node_in), dtype=jnp.float32)
        edge_inputs = jax.random.normal(ke, (n, edge_in), dtype=jnp.float32)
        for act in (None, "relu", "softplus", "sigmoid", "softmax"):
            out = bilinear_block(node_inputs, edge_inputs, weight, bias, activation=act, **kw)
            out = jax.block_until_ready(out)
            ref = bilinear_ref(node_inputs, edge_inputs, weight, bias, act)
            assert out.shape == (n, out_feats) and out.dtype == jnp.float32
            # bf16 MXU operands (f32 accumulation): tolerance scaled to output magnitude.
            scale = float(jnp.maximum(jnp.max(jnp.abs(ref)), 1.0))
            err = float(jnp.max(jnp.abs(out - ref)))
            tol = 5e-2 * scale
            if act == "softmax":
                # Probabilities compound the (documented) bf16 logit error through
                # exp/normalization; allow a slightly looser absolute tolerance.
                tol = 7.5e-2
            assert err <= tol, f"mismatch n={n} activation={act}: err={err}, tol={tol}"

    # Small batch: force the Pallas path (default would take the XLA einsum fallback here).
    check(16, min_pallas_rows=0)
    # Batch not divisible by the tile -> exercises the partial last tile (no padding copies).
    check(1000, tile_n=512)
    # Default parameters: single large resident tile.
    check(520)

    print("KERNEL_OK")
</pallas_src>

<mosaic_0001>
module attributes {stable_mosaic.version = 11 : i64} {
  func.func @kernel(%arg0: i32, %arg1: memref<16x32xf32, #tpu.memory_space<vmem>>, %arg2: memref<16x24xf32, #tpu.memory_space<vmem>>, %arg3: memref<32x384xbf16, #tpu.memory_space<vmem>>, %arg4: memref<24x384xbf16, #tpu.memory_space<vmem>>, %arg5: memref<384x16xbf16, #tpu.memory_space<vmem>>, %arg6: memref<1x16xf32, #tpu.memory_space<vmem>>, %arg7: memref<16x16xf32, #tpu.memory_space<vmem>>) attributes {dimension_semantics = [#tpu.dimension_semantics<parallel>], iteration_bounds = array<i64: 1>, scalar_prefetch = 0 : i64, scratch_operands = 0 : i64, tpu.core_type = #tpu.core_type<tc>, window_params = [{transform_indices = @transform_0, window_bounds = array<i64: 16, 32>}, {transform_indices = @transform_1, window_bounds = array<i64: 16, 24>}, {pipeline_mode = #tpu.pipeline_mode<synchronous>, transform_indices = @transform_2, window_bounds = array<i64: 32, 384>}, {pipeline_mode = #tpu.pipeline_mode<synchronous>, transform_indices = @transform_3, window_bounds = array<i64: 24, 384>}, {pipeline_mode = #tpu.pipeline_mode<synchronous>, transform_indices = @transform_4, window_bounds = array<i64: 384, 16>}, {pipeline_mode = #tpu.pipeline_mode<synchronous>, transform_indices = @transform_5, window_bounds = array<i64: 1, 16>}, {transform_indices = @transform_6, window_bounds = array<i64: 16, 16>}]} {
    %c0 = arith.constant 0 : index
    %c0_0 = arith.constant 0 : index
    %0 = vector.load %arg1[%c0, %c0_0] : memref<16x32xf32, #tpu.memory_space<vmem>>, vector<16x32xf32>
    %c0_1 = arith.constant 0 : index
    %c0_2 = arith.constant 0 : index
    %1 = vector.load %arg2[%c0_1, %c0_2] : memref<16x24xf32, #tpu.memory_space<vmem>>, vector<16x24xf32>
    %2 = arith.truncf %0 : vector<16x32xf32> to vector<16x32xbf16>
    %c0_3 = arith.constant 0 : index
    %c0_4 = arith.constant 0 : index
    %3 = vector.load %arg3[%c0_3, %c0_4] : memref<32x384xbf16, #tpu.memory_space<vmem>>, vector<32x384xbf16>
    %cst = arith.constant dense<0.000000e+00> : vector<16x384xf32>
    %4 = tpu.matmul %2, %3, %cst {dimension_numbers = #tpu.dot_dimension_numbers<[1], [0], [0], [1], [0, 0, 1, 1], [], []>} : vector<16x32xbf16>, vector<32x384xbf16>, vector<16x384xf32> -> vector<16x384xf32>
    %5 = arith.truncf %1 : vector<16x24xf32> to vector<16x24xbf16>
    %c0_5 = arith.constant 0 : index
    %c0_6 = arith.constant 0 : index
    %6 = vector.load %arg4[%c0_5, %c0_6] : memref<24x384xbf16, #tpu.memory_space<vmem>>, vector<24x384xbf16>
    %cst_7 = arith.constant dense<0.000000e+00> : vector<16x384xf32>
    %7 = tpu.matmul %5, %6, %cst_7 {dimension_numbers = #tpu.dot_dimension_numbers<[1], [0], [0], [1], [0, 0, 1, 1], [], []>} : vector<16x24xbf16>, vector<24x384xbf16>, vector<16x384xf32> -> vector<16x384xf32>
    %8 = arith.mulf %4, %7 : vector<16x384xf32>
    %9 = arith.truncf %8 : vector<16x384xf32> to vector<16x384xbf16>
    %c0_8 = arith.constant 0 : index
    %c0_9 = arith.constant 0 : index
    %10 = vector.load %arg5[%c0_8, %c0_9] : memref<384x16xbf16, #tpu.memory_space<vmem>>, vector<384x16xbf16>
    %cst_10 = arith.constant dense<0.000000e+00> : vector<16x16xf32>
    %11 = tpu.matmul %9, %10, %cst_10 {dimension_numbers = #tpu.dot_dimension_numbers<[1], [0], [0], [1], [0, 0, 1, 1], [], []>} : vector<16x384xbf16>, vector<384x16xbf16>, vector<16x16xf32> -> vector<16x16xf32>
    %c0_11 = arith.constant 0 : index
    %c0_12 = arith.constant 0 : index
    %12 = vector.load %arg6[%c0_11, %c0_12] : memref<1x16xf32, #tpu.memory_space<vmem>>, vector<1x16xf32>
    %13 = vector.broadcast %12 : vector<1x16xf32> to vector<16x16xf32>
    %14 = arith.addf %11, %13 : vector<16x16xf32>
    %c0_13 = arith.constant 0 : index
    %c0_14 = arith.constant 0 : index
    %15 = vector.load %arg7[%c0_13, %c0_14] : memref<16x16xf32, #tpu.memory_space<vmem>>, vector<16x16xf32>
    tpu.vector_store %arg7[%c0_13, %c0_14], %14 {strides = array<i32>} : memref<16x16xf32, #tpu.memory_space<vmem>>, vector<16x16xf32>,
    return
  }
  func.func @transform_0(%arg0: i32) -> (i32, i32) {
    %c0_i32 = arith.constant 0 : i32
    %c0_i32_0 = arith.constant 0 : i32
    return %arg0, %c0_i32 : i32, i32
  }
  func.func @transform_1(%arg0: i32) -> (i32, i32) {
    %c0_i32 = arith.constant 0 : i32
    %c0_i32_0 = arith.constant 0 : i32
    return %arg0, %c0_i32 : i32, i32
  }
  func.func @transform_2(%arg0: i32) -> (i32, i32) {
    %c0_i32 = arith.constant 0 : i32
    %c0_i32_0 = arith.constant 0 : i32
    %c0_i32_1 = arith.constant 0 : i32
    return %c0_i32, %c0_i32_0 : i32, i32
  }
  func.func @transform_3(%arg0: i32) -> (i32, i32) {
    %c0_i32 = arith.constant 0 : i32
    %c0_i32_0 = arith.constant 0 : i32
    %c0_i32_1 = arith.constant 0 : i32
    return %c0_i32, %c0_i32_0 : i32, i32
  }
  func.func @transform_4(%arg0: i32) -> (i32, i32) {
    %c0_i32 = arith.constant 0 : i32
    %c0_i32_0 = arith.constant 0 : i32
    %c0_i32_1 = arith.constant 0 : i32
    return %c0_i32, %c0_i32_0 : i32, i32
  }
  func.func @transform_5(%arg0: i32) -> (i32, i32) {
    %c0_i32 = arith.constant 0 : i32
    %c0_i32_0 = arith.constant 0 : i32
    %c0_i32_1 = arith.constant 0 : i32
    return %c0_i32, %c0_i32_0 : i32, i32
  }
  func.func @transform_6(%arg0: i32) -> (i32, i32) {
    %c0_i32 = arith.constant 0 : i32
    %c0_i32_0 = arith.constant 0 : i32
    return %arg0, %c0_i32 : i32, i32
  }
}

</mosaic_0001>

<bundles_post_ra>
// kernel: tile.9
= control target key start
LH: loop header
LB: loop body
LE: loop exit
PB: predicated region body
PF: predicated region fallthrough
CT: control target
= control target key end

     0   :  { %s2463_s22 = smov 3  ;;  %vm774_vm0 = vcmask 1043458   ;;  %s2470_s25 = smov 12  ;;  %vm778_vm1 = vcmask 1045508   ;;  %vm782_vm2 = vcmask 1047558   ;;  %vm868_vm3 = vcmask 130048   ;;  %s2833_s0 = inlined_call_operand.vmem [shape: bf16[24,16,24], index: 0, kind: input, shape index: {}]   ;;  %s2834_s1 = inlined_call_operand.vmem [shape: bf16[24,384], index: 1, kind: output, shape index: {}]  }
   0x1   :  { %v2439_v0 = vld [vmem:[%s2833_s0 + $0x38] sm:$0xff]   ;;  %v2310_v1 = vld [vmem:[%s2833_s0 + $0x30] sm:$0xff]   ;;  %v2311_v2 = vld [vmem:[%s2833_s0 + $0x28] sm:$0xff]   ;;  %s2472_s26 = smov 48  ;;  %s2489_s4 = smov 192  ;;  %vm864_vm4 = vcmask 64512  }
   0x2   :  { %v2244_v3 = vunpack.c.h.bf16 %v2439_v0  ;;  %v2247_v4 = vunpack.c.l.bf16 %v2310_v1  ;;  %v2248_v5 = vunpack.c.h.bf16 %v2310_v1  ;;  %v2251_v6 = vunpack.c.l.bf16 %v2311_v2  ;;  %v2312_v7 = vld [vmem:[%s2833_s0 + $0x20] sm:$0xff]   ;;  %v2313_v8 = vld [vmem:[%s2833_s0 + $0x18] sm:$0xff]   ;;  %v2314_v9 = vld [vmem:[%s2833_s0 + $0x10] sm:$0xff]   ;;  %s2507_s11 = smov 3  ;;  %s2524_s18 = smov 12 }
   0x3   :  { %v2252_v10 = vunpack.c.h.bf16 %v2311_v2  ;;  %v2255_v11 = vunpack.c.l.bf16 %v2312_v7  ;;  %v2256_v12 = vunpack.c.h.bf16 %v2312_v7  ;;  %v2259_v13 = vunpack.c.l.bf16 %v2313_v8  ;;  %v2315_v14 = vld [vmem:[%s2833_s0 + $0x8] sm:$0xff]   ;;  %v2270_v15 = vld [vmem:[%s2833_s0] sm:$0xff]   ;;  %v2468_v16 = vld [vmem:[%s2833_s0 + $0xb8] sm:$0xff]   ;;  %s2526_s19 = smov 48  ;;  %s2541_s29 = smov 192 }
   0x4   :  { %533 = vst [vmem:[#allocation1 + $0x78] sm:$0xff] %v2244_v3  ;;  %565 = vst [vmem:[#allocation1 + $0x68] sm:$0xff] %v2248_v5  ;;  %v2260_v17 = vunpack.c.h.bf16 %v2313_v8  ;;  %v2263_v18 = vunpack.c.l.bf16 %v2314_v9  ;;  %v2264_v19 = vunpack.c.h.bf16 %v2314_v9  ;;  %v2267_v20 = vunpack.c.l.bf16 %v2315_v14  ;;  %v2477_v21 = vld [vmem:[%s2833_s0 + $0xb0] sm:$0xff]   ;;  %v2482_v22 = vld [vmem:[%s2833_s0 + $0xa8] sm:$0xff]   ;;  %s2543_s30 = smov 3  ;;  %s2556_s9 = smov 48 }
   0x5   :  { %581 = vst [vmem:[#allocation1 + $0x60] sm:$0xff] %v2247_v4  ;;  %613 = vst [vmem:[#allocation1 + $0x50] sm:$0xff] %v2251_v6  ;;  %v2487_v23 = vld [vmem:[%s2833_s0 + $0xa0] sm:$0xff]   ;;  %v2268_v24 = vunpack.c.h.bf16 %v2315_v14  ;;  %v2271_v25 = vunpack.c.l.bf16 %v2270_v15  ;;  %v2272_v26 = vunpack.c.h.bf16 %v2270_v15  ;;  %v2243_v27 = vunpack.c.l.bf16 %v2439_v0  ;;  %v2495_v28 = vld [vmem:[%s2833_s0 + $0x98] sm:$0xff]   ;;  %s2558_s10 = smov 192  ;;  %s2560_s12 = smov 3 }
   0x6   :  { %597 = vst [vmem:[#allocation1 + $0x58] sm:$0xff] %v2252_v10  ;;  %629 = vst [vmem:[#allocation1 + $0x48] sm:$0xff] %v2256_v12  ;;  %v2500_v29 = vld [vmem:[%s2833_s0 + $0x90] sm:$0xff]   ;;  %v2505_v30 = vld [vmem:[%s2833_s0 + $0x88] sm:$0xff]   ;;  %v2180_v31 = vunpack.c.h.bf16 %v2468_v16  ;;  %v2184_v32 = vunpack.c.h.bf16 %v2477_v21  ;;  %v2188_v33 = vunpack.c.h.bf16 %v2482_v22  ;;  %v2192_v34 = vunpack.c.h.bf16 %v2487_v23  ;;  %s2562_s13 = smov 12  ;;  %s2564_s14 = smov 48 }
   0x7   :  { %645 = vst [vmem:[#allocation1 + $0x40] sm:$0xff] %v2255_v11  ;;  %677 = vst [vmem:[#allocation1 + $0x30] sm:$0xff] %v2259_v13  ;;  %v2516_v35 = vld [vmem:[%s2833_s0 + $0x80] sm:$0xff]   ;;  %v2301_v36 = vld [vmem:[%s2833_s0 + $0x78] sm:$0xff]   ;;  %v2196_v38 = vunpack.c.h.bf16 %v2495_v28  ;;  %v2200_v39 = vunpack.c.h.bf16 %v2500_v29  ;;  %v2204_v40 = vunpack.c.h.bf16 %v2505_v30  ;;  %s2566_s15 = smov 192  ;;  %v2179_v0 = vunpack.c.l.bf16 %v2468_v16  ;;  %s1173_s16 = smov 3 }
   0x8   :  { %661 = vst [vmem:[#allocation1 + $0x38] sm:$0xff] %v2260_v17  ;;  %693 = vst [vmem:[#allocation1 + $0x28] sm:$0xff] %v2264_v19  ;;  %v2302_v37 = vld [vmem:[%s2833_s0 + $0x70] sm:$0xff]   ;;  %v2208_v41 = vunpack.c.h.bf16 %v2516_v35  ;;  %v2303_v42 = vld [vmem:[%s2833_s0 + $0x68] sm:$0xff]   ;;  %v2212_v45 = vunpack.c.h.bf16 %v2301_v36  ;;  %v2211_v56 = vunpack.c.l.bf16 %v2301_v36  ;;  %v2183_v1 = vunpack.c.l.bf16 %v2477_v21  ;;  %s1176_s17 = smov 12  ;;  %s1181_s20 = smov 48 }
   0x9   :  { %709 = vst [vmem:[#allocation1 + $0x20] sm:$0xff] %v2263_v18  ;;  %741 = vst [vmem:[#allocation1 + $0x10] sm:$0xff] %v2267_v20  ;;  %v2304_v43 = vld [vmem:[%s2833_s0 + $0x60] sm:$0xff]   ;;  %v2305_v44 = vld [vmem:[%s2833_s0 + $0x58] sm:$0xff]   ;;  %v2216_v46 = vunpack.c.h.bf16 %v2302_v37  ;;  %v2220_v47 = vunpack.c.h.bf16 %v2303_v42  ;;  %v2215_v57 = vunpack.c.l.bf16 %v2302_v37  ;;  %v2219_v58 = vunpack.c.l.bf16 %v2303_v42  ;;  %s2576_s21 = smov 192  ;;  %s2411_s23 = smov 96  }
   0xa   :  { %725 = vst [vmem:[#allocation1 + $0x18] sm:$0xff] %v2268_v24  ;;  %756 = vst [vmem:[#allocation1 + $0x8] sm:$0xff] %v2272_v26  ;;  %v2224_v48 = vunpack.c.h.bf16 %v2304_v43  ;;  %v2306_v49 = vld [vmem:[%s2833_s0 + $0x50] sm:$0xff]   ;;  %v2307_v50 = vld [vmem:[%s2833_s0 + $0x48] sm:$0xff]   ;;  %v2228_v52 = vunpack.c.h.bf16 %v2305_v44  ;;  %v2223_v59 = vunpack.c.l.bf16 %v2304_v43  ;;  %v2227_v60 = vunpack.c.l.bf16 %v2305_v44  ;;  %s974_s24 = smov 48  ;;  %s979_s27 = smov 192 }
   0xb   :  { %769 = vst [vmem:[#allocation1] sm:$0xff] %v2271_v25  ;;  %549 = vst [vmem:[#allocation1 + $0x70] sm:$0xff] %v2243_v27  ;;  %v2308_v51 = vld [vmem:[%s2833_s0 + $0x40] sm:$0xff]   ;;  %s2554_s0 = smov 12  ;;  %v2232_v53 = vunpack.c.h.bf16 %v2306_v49  ;;  %v2236_v54 = vunpack.c.h.bf16 %v2307_v50  ;;  %v2231_v61 = vunpack.c.l.bf16 %v2306_v49  ;;  %v2235_v62 = vunpack.c.l.bf16 %v2307_v50  ;;  %s984_s28 = smov 3 }
   0xc   :  { %21 = vst [vmem:[#allocation1 + $0x178] sm:$0xff] %v2180_v31  ;;  %53 = vst [vmem:[#allocation1 + $0x168] sm:$0xff] %v2184_v32  ;;  %v2240_v55 = vunpack.c.h.bf16 %v2308_v51  ;;  %v2239_v63 = vunpack.c.l.bf16 %v2308_v51  ;;  %v2187_v2 = vunpack.c.l.bf16 %v2482_v22  ;;  %v2191_v3 = vunpack.c.l.bf16 %v2487_v23  ;;  %s997_s2 = smov 192  ;;  %s1012_s3 = smov 3 }
   0xd   :  { %85 = vst [vmem:[#allocation1 + $0x158] sm:$0xff] %v2188_v33  ;;  %117 = vst [vmem:[#allocation1 + $0x148] sm:$0xff] %v2192_v34  ;;  %v2195_v4 = vunpack.c.l.bf16 %v2495_v28  ;;  %v2199_v5 = vunpack.c.l.bf16 %v2500_v29  ;;  %v2203_v6 = vunpack.c.l.bf16 %v2505_v30  ;;  %v2207_v7 = vunpack.c.l.bf16 %v2516_v35  ;;  %s1015_s5 = smov 12  ;;  %s1020_s6 = smov 48 }
   0xe   :  { %149 = vst [vmem:[#allocation1 + $0x138] sm:$0xff] %v2196_v38  ;;  %181 = vst [vmem:[#allocation1 + $0x128] sm:$0xff] %v2200_v39  ;;  %s1025_s7 = smov 192  ;;  %s1030_s8 = smov 3  ;;  %vm784_vm5 = vcmask 195584   ;;  %vm1123_vm6 = vcmask 1048384  }
   0xf   :  { %213 = vst [vmem:[#allocation1 + $0x118] sm:$0xff] %v2204_v40  ;;  %245 = vst [vmem:[#allocation1 + $0x108] sm:$0xff] %v2208_v41  ;;  %vm871_vm7 = vcmask 1048512   ;;  %vm1192_vm8 = vcmask 982784   ;;  %vm1008_vm9 = vcmask 1048448   ;;  %vm1260_vm10 = vcmask 917184  }
  0x10   :  { %277 = vst [vmem:[#allocation1 + $0xf8] sm:$0xff] %v2212_v45  ;;  %309 = vst [vmem:[#allocation1 + $0xe8] sm:$0xff] %v2216_v46  ;;  %vm1329_vm11 = vcmask 851584   ;;  %vm1398_vm12 = vcmask 785984   ;;  %vm1466_vm13 = vcmask 720384   ;;  %vm1535_vm14 = vcmask 654784  }
  0x11   :  { %341 = vst [vmem:[#allocation1 + $0xd8] sm:$0xff] %v2220_v47  ;;  %373 = vst [vmem:[#allocation1 + $0xc8] sm:$0xff] %v2224_v48  ;;  %v1151_v8 = vld [vmem:[#allocation1 + $0xf] ss:$16 sm:%s2463_s22]   ;;  %s1195_s22 = smov 3  ;;  %vm1604_vm15 = vcmask 589184  }
  0x12   :  { %405 = vst [vmem:[#allocation1 + $0xb8] sm:$0xff] %v2228_v52  ;;  %437 = vst [vmem:[#allocation1 + $0xa8] sm:$0xff] %v2232_v53  ;;  %v1154_v9 = vld [vmem:[#allocation1 + $0xf] ss:$16 sm:%s2470_s25]   ;;  %v1174_v13 = vld [vmem:[#allocation1 + $0x4] ss:$16 sm:%s1173_s16]  }
  0x13   :  { %469 = vst [vmem:[#allocation1 + $0x98] sm:$0xff] %v2236_v54  ;;  %501 = vst [vmem:[#allocation1 + $0x88] sm:$0xff] %v2240_v55  ;;  %v1159_v10 = vld [vmem:[#allocation1 + $0xf] ss:$16 sm:%s2472_s26]   ;;  %v1156_v11 = vsel %vm774_vm0, %v1154_v9, %v1151_v8  ;;  %v1177_v14 = vld [vmem:[#allocation1 + $0x4] ss:$16 sm:%s1176_s17]  }
  0x14   :  { %293 = vst [vmem:[#allocation1 + $0xf0] sm:$0xff] %v2211_v56  ;;  %325 = vst [vmem:[#allocation1 + $0xe0] sm:$0xff] %v2215_v57  ;;  %v1164_v12 = vld [vmem:[#allocation1 + $0xf] ss:$16 sm:%s2489_s4]   ;;  %v1161_v15 = vsel %vm778_vm1, %v1159_v10, %v1156_v11  ;;  %v1179_v22 = vsel %vm774_vm0, %v1177_v14, %v1174_v13  ;;  %v1182_v23 = vld [vmem:[#allocation1 + $0x4] ss:$16 sm:%s1181_s20]  }
  0x15   :  { %357 = vst [vmem:[#allocation1 + $0xd0] sm:$0xff] %v2219_v58  ;;  %389 = vst [vmem:[#allocation1 + $0xc0] sm:$0xff] %v2223_v59  ;;  %v1166_v19 = vsel %vm782_vm2, %v1164_v12, %v1161_v15  ;;  %s1198_s25 = smov 12  ;;  %s2410_s26 = smov 104   ;;  %v1187_v31 = vld [vmem:[#allocation1 + $0x4] ss:$16 sm:%s2576_s21]   ;;  %v1184_v36 = vsel %vm778_vm1, %v1182_v23, %v1179_v22 }
  0x16   :  { %421 = vst [vmem:[#allocation1 + $0xb0] sm:$0xff] %v2227_v60  ;;  %453 = vst [vmem:[#allocation1 + $0xa0] sm:$0xff] %v2231_v61  ;;  %v1105_v16 = vld [vmem:[#allocation1 + $0x10f] ss:$16 sm:%s2507_s11]   ;;  %1167 = vrot.lane.b32.xlu1 %v1166_v19, %s2410_s26  ;;  %s1203_s4 = smov 48  ;;  %s1208_s11 = smov 192  ;;  %v1189_v46 = vsel %vm782_vm2, %v1187_v31, %v1184_v36 }
  0x17   :  { %485 = vst [vmem:[#allocation1 + $0x90] sm:$0xff] %v2235_v62  ;;  %517 = vst [vmem:[#allocation1 + $0x80] sm:$0xff] %v2239_v63  ;;  %v1108_v17 = vld [vmem:[#allocation1 + $0x10f] ss:$16 sm:%s2524_s18]   ;;  %s966_s18 = smov 3  ;;  %s847_s16 = smov 3 }
  0x18   :  { %37 = vst [vmem:[#allocation1 + $0x170] sm:$0xff] %v2179_v0  ;;  %69 = vst [vmem:[#allocation1 + $0x160] sm:$0xff] %v2183_v1  ;;  %v1113_v18 = vld [vmem:[#allocation1 + $0x10f] ss:$16 sm:%s2526_s19]   ;;  %v1110_v20 = vsel %vm774_vm0, %v1108_v17, %v1105_v16  ;;  %s969_s19 = smov 12  ;;  %s850_s17 = smov 12 }
  0x19   :  { %101 = vst [vmem:[#allocation1 + $0x150] sm:$0xff] %v2187_v2  ;;  %133 = vst [vmem:[#allocation1 + $0x140] sm:$0xff] %v2191_v3  ;;  %v1118_v21 = vld [vmem:[#allocation1 + $0x10f] ss:$16 sm:%s2541_s29]   ;;  %v1115_v24 = vsel %vm778_vm1, %v1113_v18, %v1110_v20  ;;  %v967_v49 = vld [vmem:[#allocation1 + $0x10a] ss:$16 sm:%s966_s18]  }
  0x1a   :  { %165 = vst [vmem:[#allocation1 + $0x130] sm:$0xff] %v2195_v4  ;;  %197 = vst [vmem:[#allocation1 + $0x120] sm:$0xff] %v2199_v5  ;;  %v1128_v25 = vld [vmem:[#allocation1 + $0x8f] ss:$16 sm:%s2543_s30]   ;;  %v1120_v28 = vsel %vm782_vm2, %v1118_v21, %v1115_v24  ;;  %v970_v50 = vld [vmem:[#allocation1 + $0x10a] ss:$16 sm:%s969_s19]  }
  0x1b   :  { %229 = vst [vmem:[#allocation1 + $0x110] sm:$0xff] %v2203_v6  ;;  %261 = vst [vmem:[#allocation1 + $0x100] sm:$0xff] %v2207_v7  ;;  %v1131_v26 = vld [vmem:[#allocation1 + $0x8f] ss:$16 sm:%s2554_s0]   ;;  %v972_v52 = vsel %vm774_vm0, %v970_v50, %v967_v49  ;;  %v975_v54 = vld [vmem:[#allocation1 + $0x10a] ss:$16 sm:%s974_s24]  }
  0x1c   :  { %v1136_v27 = vld [vmem:[#allocation1 + $0x8f] ss:$16 sm:%s2556_s9]   ;;  %v1133_v29 = vsel %vm774_vm0, %v1131_v26, %v1128_v25  ;;  %v980_v55 = vld [vmem:[#allocation1 + $0x10a] ss:$16 sm:%s979_s27]   ;;  %s987_s29 = smov 12  ;;  %s992_s30 = smov 48  ;;  %v977_v59 = vsel %vm778_vm1, %v975_v54, %v972_v52 }
  0x1d   :  { %v1141_v30 = vld [vmem:[#allocation1 + $0x8f] ss:$16 sm:%s2558_s10]   ;;  %v1138_v32 = vsel %vm778_vm1, %v1136_v27, %v1133_v29  ;;  %v985_v57 = vld [vmem:[#allocation1 + $0x8a] ss:$16 sm:%s984_s28]   ;;  %v982_v3 = vsel %vm782_vm2, %v980_v55, %v977_v59  ;;  %s1033_s0 = smov 12  ;;  %s1038_s9 = smov 48 }
  0x1e   :  { %v1219_v33 = vld [vmem:[#allocation1 + $0x84] ss:$16 sm:%s2560_s12]   ;;  %v1143_v37 = vsel %vm782_vm2, %v1141_v30, %v1138_v32  ;;  %v988_v58 = vld [vmem:[#allocation1 + $0x8a] ss:$16 sm:%s987_s29]   ;;  %s1043_s10 = smov 192  ;;  %s829_s12 = smov 3 }
  0x1f   :  { %v1222_v34 = vld [vmem:[#allocation1 + $0x84] ss:$16 sm:%s2562_s13]   ;;  %v2335_v40 = vpack.i.bf16 %v1143_v37, %v1120_v28  ;;  %v990_v60 = vsel %vm774_vm0, %v988_v58, %v985_v57  ;;  %v993_v61 = vld [vmem:[#allocation1 + $0x8a] ss:$16 sm:%s992_s30]   ;;  %v830_v14 = vld [vmem:[#allocation1 + $0x85] ss:$16 sm:%s829_s12]  }
  0x20   :  { %v1227_v35 = vld [vmem:[#allocation1 + $0x84] ss:$16 sm:%s2564_s14]   ;;  %v1224_v38 = vsel %vm774_vm0, %v1222_v34, %v1219_v33  ;;  %v998_v62 = vld [vmem:[#allocation1 + $0x8a] ss:$16 sm:%s997_s2]   ;;  %v995_v63 = vsel %vm778_vm1, %v993_v61, %v990_v60  ;;  %s832_s13 = smov 12  ;;  %s837_s14 = smov 48 }
  0x21   :  { %v1232_v39 = vld [vmem:[#allocation1 + $0x84] ss:$16 sm:%s2566_s15]   ;;  %v1229_v41 = vsel %vm778_vm1, %v1227_v35, %v1224_v38  ;;  %2336 = vrot.lane.b32.xlu0 %v2335_v40, %s2410_s26  ;;  %v1013_v0 = vld [vmem:[#allocation1 + $0x8a] ss:$16 sm:%s1012_s3]   ;;  %v1000_v4 = vsel %vm782_vm2, %v998_v62, %v995_v63  ;;  %v833_v17 = vld [vmem:[#allocation1 + $0x85] ss:$16 sm:%s832_s13]  }
  0x22   :  { %v1196_v42 = vld [vmem:[#allocation1 + $0x104] ss:$16 sm:%s1195_s22]   ;;  %v1234_v45 = vsel %vm782_vm2, %v1232_v39, %v1229_v41  ;;  %v1016_v1 = vld [vmem:[#allocation1 + $0x8a] ss:$16 sm:%s1015_s5]   ;;  %v1002_v15 = vsel %vm868_vm3, %v1000_v4, %v982_v3  ;;  %v838_v18 = vld [vmem:[#allocation1 + $0x85] ss:$16 sm:%s837_s14]   ;;  %v835_v20 = vsel %vm774_vm0, %v833_v17, %v830_v14 }
  0x23   :  { %v1199_v43 = vld [vmem:[#allocation1 + $0x104] ss:$16 sm:%s1198_s25]   ;;  %1235 = vrot.lane.b32.xlu1 %v1234_v45, %s2411_s23  ;;  %v1021_v2 = vld [vmem:[#allocation1 + $0x8a] ss:$16 sm:%s1020_s6]   ;;  %v1018_v5 = vsel %vm774_vm0, %v1016_v1, %v1013_v0  ;;  %s842_s15 = smov 192  ;;  %s855_s20 = smov 48  ;;  %v840_v24 = vsel %vm778_vm1, %v838_v18, %v835_v20 }
  0x24   :  { %v1204_v44 = vld [vmem:[#allocation1 + $0x104] ss:$16 sm:%s1203_s4]   ;;  %v1201_v47 = vsel %vm774_vm0, %v1199_v43, %v1196_v42  ;;  %v1026_v6 = vld [vmem:[#allocation1 + $0x8a] ss:$16 sm:%s1025_s7]   ;;  %v1023_v8 = vsel %vm778_vm1, %v1021_v2, %v1018_v5  ;;  %v843_v21 = vld [vmem:[#allocation1 + $0x85] ss:$16 sm:%s842_s15]  }
  0x25   :  { %v1209_v48 = vld [vmem:[#allocation1 + $0x104] ss:$16 sm:%s1208_s11]   ;;  %v1206_v51 = vsel %vm778_vm1, %v1204_v44, %v1201_v47  ;;  %v1031_v7 = vld [vmem:[#allocation1 + $0xa] ss:$16 sm:%s1030_s8]   ;;  %v1028_v11 = vsel %vm782_vm2, %v1026_v6, %v1023_v8  ;;  %v848_v22 = vld [vmem:[#allocation1 + $0x5] ss:$16 sm:%s847_s16]   ;;  %v845_v33 = vsel %vm782_vm2, %v843_v21, %v840_v24 }
  0x26   :  { %v1211_v53 = vsel %vm782_vm2, %v1209_v48, %v1206_v51  ;;  %v1034_v9 = vld [vmem:[#allocation1 + $0xa] ss:$16 sm:%s1033_s0]   ;;  %v851_v25 = vld [vmem:[#allocation1 + $0x5] ss:$16 sm:%s850_s17]   ;;  %s860_s21 = smov 192  ;;  %s874_s22 = smov 3 }
  0x27   :  { %v2340_v56 = vpack.i.bf16 %v1211_v53, %v1189_v46  ;;  %v1039_v10 = vld [vmem:[#allocation1 + $0xa] ss:$16 sm:%s1038_s9]   ;;  %v1036_v12 = vsel %vm774_vm0, %v1034_v9, %v1031_v7  ;;  %v856_v26 = vld [vmem:[#allocation1 + $0x5] ss:$16 sm:%s855_s20]   ;;  %v853_v28 = vsel %vm774_vm0, %v851_v25, %v848_v22  ;;  %s877_s25 = smov 12  ;;  %s882_s26 = smov 48 }
  0x28   :  { %v1044_v13 = vld [vmem:[#allocation1 + $0xa] ss:$16 sm:%s1043_s10]   ;;  %v1041_v16 = vsel %vm778_vm1, %v1039_v10, %v1036_v12  ;;  %v861_v29 = vld [vmem:[#allocation1 + $0x5] ss:$16 sm:%s860_s21]   ;;  %v858_v30 = vsel %vm778_vm1, %v856_v26, %v853_v28  ;;  %s887_s4 = smov 192  ;;  %s2412_s11 = smov 112  }
  0x29   :  { %2341 = vrot.lane.b32.xlu0 %v2340_v56, %s2411_s23  ;;  %v1046_v19 = vsel %vm782_vm2, %v1044_v13, %v1041_v16  ;;  %v875_v31 = vld [vmem:[#allocation1 + $0x5] ss:$16 sm:%s874_s22]   ;;  %v863_v34 = vsel %vm782_vm2, %v861_v29, %v858_v30  ;;  %s892_s18 = smov 3  ;;  %s895_s19 = smov 12 }
  0x2a   :  { %v1048_v23 = vsel %vm868_vm3, %v1046_v19, %v1028_v11  ;;  %v878_v32 = vld [vmem:[#allocation1 + $0x5] ss:$16 sm:%s877_s25]   ;;  %s900_s23 = smov 48  ;;  %s905_s24 = smov 192  ;;  %v865_v45 = vsel %vm864_vm4, %v863_v34, %v845_v33 }
  0x2b   :  { %v2355_v27 = vpack.i.bf16 %v1048_v23, %v1002_v15  ;;  %v880_v35 = vsel %vm774_vm0, %v878_v32, %v875_v31  ;;  %v883_v36 = vld [vmem:[#allocation1 + $0x5] ss:$16 sm:%s882_s26]   ;;  %s1058_s27 = smov 3  ;;  %s1061_s28 = smov 12 }
  0x2c   :  { %v888_v37 = vld [vmem:[#allocation1 + $0x5] ss:$16 sm:%s887_s4]   ;;  %v885_v38 = vsel %vm778_vm1, %v883_v36, %v880_v35  ;;  %v1059_v47 = vld [vmem:[#allocation1 + $0xa] ss:$16 sm:%s1058_s27]   ;;  %s1066_s29 = smov 48  ;;  %s1071_s30 = smov 192 }
  0x2d   :  { %2356 = vrot.lane.b32.xlu1 %v2355_v27, %s2412_s11  ;;  %v893_v39 = vld [vmem:[#allocation1 + $0x105] ss:$16 sm:%s892_s18]   ;;  %v890_v41 = vsel %vm782_vm2, %v888_v37, %v885_v38  ;;  %v1062_v48 = vld [vmem:[#allocation1 + $0xa] ss:$16 sm:%s1061_s28]   ;;  %s1076_s2 = smov 3  ;;  %s1079_s3 = smov 12 }
  0x2e   :  { %v896_v40 = vld [vmem:[#allocation1 + $0x105] ss:$16 sm:%s895_s19]   ;;  %v1064_v50 = vsel %vm774_vm0, %v1062_v48, %v1059_v47  ;;  %v1067_v51 = vld [vmem:[#allocation1 + $0xa] ss:$16 sm:%s1066_s29]   ;;  %s1084_s5 = smov 48  ;;  %s1089_s6 = smov 192 }
  0x2f   :  { %v898_v42 = vsel %vm774_vm0, %v896_v40, %v893_v39  ;;  %v901_v43 = vld [vmem:[#allocation1 + $0x105] ss:$16 sm:%s900_s23]   ;;  %v1072_v52 = vld [vmem:[#allocation1 + $0xa] ss:$16 sm:%s1071_s30]   ;;  %v1069_v54 = vsel %vm778_vm1, %v1067_v51, %v1064_v50  ;;  %s920_s7 = smov 3  ;;  %s923_s8 = smov 12 }
  0x30   :  { %v906_v44 = vld [vmem:[#allocation1 + $0x105] ss:$16 sm:%s905_s24]   ;;  %v903_v46 = vsel %vm778_vm1, %v901_v43, %v898_v42  ;;  %v1077_v55 = vld [vmem:[#allocation1 + $0x10a] ss:$16 sm:%s1076_s2]   ;;  %v1074_v58 = vsel %vm782_vm2, %v1072_v52, %v1069_v54  ;;  %s928_s0 = smov 48  ;;  %s933_s9 = smov 192 }
  0x31   :  { %v908_v49 = vsel %vm782_vm2, %v906_v44, %v903_v46  ;;  %v1080_v56 = vld [vmem:[#allocation1 + $0x10a] ss:$16 sm:%s1079_s3]   ;;  %v921_v63 = vld [vmem:[#allocation1 + $0x105] ss:$16 sm:%s920_s7]   ;;  %s2413_s10 = smov 120   ;;  %s938_s12 = smov 3 }
  0x32   :  { %v910_v53 = vsel %vm864_vm4, %v908_v49, %v890_v41  ;;  %v1082_v59 = vsel %vm774_vm0, %v1080_v56, %v1077_v55  ;;  %v1085_v60 = vld [vmem:[#allocation1 + $0x10a] ss:$16 sm:%s1084_s5]   ;;  %v924_v0 = vld [vmem:[#allocation1 + $0x105] ss:$16 sm:%s923_s8]   ;;  %s941_s13 = smov 12  ;;  %s946_s14 = smov 48 }
  0x33   :  { %v2345_v57 = vpack.i.bf16 %v910_v53, %v865_v45  ;;  %v1090_v61 = vld [vmem:[#allocation1 + $0x10a] ss:$16 sm:%s1089_s6]   ;;  %v1087_v62 = vsel %vm778_vm1, %v1085_v60, %v1082_v59  ;;  %v926_v2 = vsel %vm774_vm0, %v924_v0, %v921_v63  ;;  %v929_v3 = vld [vmem:[#allocation1 + $0x105] ss:$16 sm:%s928_s0]   ;;  %s951_s15 = smov 192  ;;  %s1287_s16 = smov 3 }
  0x34   :  { %v1092_v1 = vsel %vm782_vm2, %v1090_v61, %v1087_v62  ;;  %v934_v4 = vld [vmem:[#allocation1 + $0x105] ss:$16 sm:%s933_s9]   ;;  %v931_v6 = vsel %vm778_vm1, %v929_v3, %v926_v2  ;;  %v1288_v14 = vld [vmem:[#allocation1 + $0x109] ss:$16 sm:%s1287_s16]   ;;  %s1290_s17 = smov 12  ;;  %s1295_s20 = smov 48 }
  0x35   :  { %2346 = vrot.lane.b32.xlu0 %v2345_v57, %s2413_s10  ;;  %v1094_v5 = vsel %vm868_vm3, %v1092_v1, %v1074_v58  ;;  %v939_v7 = vld [vmem:[#allocation1 + $0x85] ss:$16 sm:%s938_s12]   ;;  %v936_v9 = vsel %vm782_vm2, %v934_v4, %v931_v6  ;;  %v1291_v16 = vld [vmem:[#allocation1 + $0x109] ss:$16 sm:%s1290_s17]   ;;  %s1300_s21 = smov 192  ;;  %s1241_s22 = smov 3 }
  0x36   :  { %v942_v8 = vld [vmem:[#allocation1 + $0x85] ss:$16 sm:%s941_s13]   ;;  %1095 = vrot.lane.b32.xlu1 %v1094_v5, %s2412_s11  ;;  %v1296_v17 = vld [vmem:[#allocation1 + $0x109] ss:$16 sm:%s1295_s20]   ;;  %v1293_v19 = vsel %vm774_vm0, %v1291_v16, %v1288_v14  ;;  %s1244_s25 = smov 12  ;;  %s1249_s26 = smov 48 }
  0x37   :  { %v944_v10 = vsel %vm774_vm0, %v942_v8, %v939_v7  ;;  %v947_v11 = vld [vmem:[#allocation1 + $0x85] ss:$16 sm:%s946_s14]   ;;  %v1301_v20 = vld [vmem:[#allocation1 + $0x109] ss:$16 sm:%s1300_s21]   ;;  %v1298_v22 = vsel %vm778_vm1, %v1296_v17, %v1293_v19  ;;  %s1254_s4 = smov 192  ;;  %s1264_s11 = smov 3 }
  0x38   :  { %v952_v12 = vld [vmem:[#allocation1 + $0x85] ss:$16 sm:%s951_s15]   ;;  %v949_v13 = vsel %vm778_vm1, %v947_v11, %v944_v10  ;;  %v1242_v21 = vld [vmem:[#allocation1 + $0x89] ss:$16 sm:%s1241_s22]   ;;  %v1303_v25 = vsel %vm782_vm2, %v1301_v20, %v1298_v22  ;;  %s1267_s18 = smov 12  ;;  %s1272_s19 = smov 48 }
  0x39   :  { %v954_v15 = vsel %vm782_vm2, %v952_v12, %v949_v13  ;;  %v1245_v23 = vld [vmem:[#allocation1 + $0x89] ss:$16 sm:%s1244_s25]   ;;  %s2414_s23 = smov 88   ;;  %s1277_s24 = smov 192 }
  0x3a   :  { %v956_v18 = vsel %vm864_vm4, %v954_v15, %v936_v9  ;;  %v1250_v24 = vld [vmem:[#allocation1 + $0x89] ss:$16 sm:%s1249_s26]   ;;  %v1247_v26 = vsel %vm774_vm0, %v1245_v23, %v1242_v21  ;;  %1304 = vrot.lane.b32.xlu1 %v1303_v25, %s2414_s23  ;;  %s1356_s27 = smov 3  ;;  %s1359_s28 = smov 12 }
  0x3b   :  { %957 = vrot.lane.b32.xlu0 %v956_v18, %s2413_s10  ;;  %v1255_v27 = vld [vmem:[#allocation1 + $0x89] ss:$16 sm:%s1254_s4]   ;;  %v1252_v29 = vsel %vm778_vm1, %v1250_v24, %v1247_v26  ;;  %v1357_v36 = vld [vmem:[#allocation1 + $0xe] ss:$16 sm:%s1356_s27]   ;;  %s1364_s29 = smov 48  ;;  %s1369_s30 = smov 192 }
  0x3c   :  { %v1265_v28 = vld [vmem:[#allocation1 + $0x9] ss:$16 sm:%s1264_s11]   ;;  %v1257_v32 = vsel %vm782_vm2, %v1255_v27, %v1252_v29  ;;  %v1360_v37 = vld [vmem:[#allocation1 + $0xe] ss:$16 sm:%s1359_s28]   ;;  %s1310_s2 = smov 3  ;;  %s1313_s3 = smov 12 }
  0x3d   :  { %v1268_v30 = vld [vmem:[#allocation1 + $0x9] ss:$16 sm:%s1267_s18]   ;;  %v1362_v39 = vsel %vm774_vm0, %v1360_v37, %v1357_v36  ;;  %v1365_v40 = vld [vmem:[#allocation1 + $0xe] ss:$16 sm:%s1364_s29]   ;;  %s1318_s5 = smov 48  ;;  %s1323_s6 = smov 192 }
  0x3e   :  { %v1273_v31 = vld [vmem:[#allocation1 + $0x9] ss:$16 sm:%s1272_s19]   ;;  %v1270_v33 = vsel %vm774_vm0, %v1268_v30, %v1265_v28  ;;  %v1370_v41 = vld [vmem:[#allocation1 + $0xe] ss:$16 sm:%s1369_s30]   ;;  %v1367_v43 = vsel %vm778_vm1, %v1365_v40, %v1362_v39  ;;  %s1333_s7 = smov 3  ;;  %s1336_s8 = smov 12 }
  0x3f   :  { %v1278_v34 = vld [vmem:[#allocation1 + $0x9] ss:$16 sm:%s1277_s24]   ;;  %v1275_v35 = vsel %vm778_vm1, %v1273_v31, %v1270_v33  ;;  %v1311_v44 = vld [vmem:[#allocation1 + $0x10e] ss:$16 sm:%s1310_s2]   ;;  %v1372_v46 = vsel %vm782_vm2, %v1370_v41, %v1367_v43  ;;  %s2415_s0 = smov 80   ;;  %s1341_s9 = smov 48 }
  0x40   :  { %v1280_v38 = vsel %vm782_vm2, %v1278_v34, %v1275_v35  ;;  %v1314_v45 = vld [vmem:[#allocation1 + $0x10e] ss:$16 sm:%s1313_s3]   ;;  %1373 = vrot.lane.b32.xlu1 %v1372_v46, %s2415_s0  ;;  %s1346_s10 = smov 192  ;;  %s1424_s12 = smov 3 }
  0x41   :  { %v2350_v42 = vpack.i.bf16 %v1280_v38, %v1257_v32  ;;  %v1316_v47 = vsel %vm774_vm0, %v1314_v45, %v1311_v44  ;;  %v1319_v48 = vld [vmem:[#allocation1 + $0x10e] ss:$16 sm:%s1318_s5]   ;;  %v1425_v58 = vld [vmem:[#allocation1 + $0x83] ss:$16 sm:%s1424_s12]   ;;  %s1427_s13 = smov 12  ;;  %s1432_s14 = smov 48 }
  0x42   :  { %v1324_v49 = vld [vmem:[#allocation1 + $0x10e] ss:$16 sm:%s1323_s6]   ;;  %v1321_v50 = vsel %vm778_vm1, %v1319_v48, %v1316_v47  ;;  %v1428_v60 = vld [vmem:[#allocation1 + $0x83] ss:$16 sm:%s1427_s13]   ;;  %s1437_s15 = smov 192  ;;  %s1379_s16 = smov 3 }
  0x43   :  { %2351 = vrot.lane.b32.xlu0 %v2350_v42, %s2414_s23  ;;  %v1334_v51 = vld [vmem:[#allocation1 + $0x8e] ss:$16 sm:%s1333_s7]   ;;  %v1326_v53 = vsel %vm782_vm2, %v1324_v49, %v1321_v50  ;;  %v1433_v61 = vld [vmem:[#allocation1 + $0x83] ss:$16 sm:%s1432_s14]   ;;  %v1430_v63 = vsel %vm774_vm0, %v1428_v60, %v1425_v58  ;;  %s1382_s17 = smov 12  ;;  %s1387_s20 = smov 48 }
  0x44   :  { %v1337_v52 = vld [vmem:[#allocation1 + $0x8e] ss:$16 sm:%s1336_s8]   ;;  %v1438_v0 = vld [vmem:[#allocation1 + $0x83] ss:$16 sm:%s1437_s15]   ;;  %v1435_v2 = vsel %vm778_vm1, %v1433_v61, %v1430_v63  ;;  %s1392_s21 = smov 192  ;;  %s1401_s22 = smov 3 }
  0x45   :  { %v1339_v54 = vsel %vm774_vm0, %v1337_v52, %v1334_v51  ;;  %v1342_v55 = vld [vmem:[#allocation1 + $0x8e] ss:$16 sm:%s1341_s9]   ;;  %v1380_v1 = vld [vmem:[#allocation1 + $0x3] ss:$16 sm:%s1379_s16]   ;;  %v1440_v5 = vsel %vm782_vm2, %v1438_v0, %v1435_v2  ;;  %s1404_s25 = smov 12  ;;  %s1409_s26 = smov 48 }
  0x46   :  { %v1347_v56 = vld [vmem:[#allocation1 + $0x8e] ss:$16 sm:%s1346_s10]   ;;  %v1344_v57 = vsel %vm778_vm1, %v1342_v55, %v1339_v54  ;;  %v1383_v3 = vld [vmem:[#allocation1 + $0x3] ss:$16 sm:%s1382_s17]   ;;  %s2416_s4 = smov 72   ;;  %s1414_s11 = smov 192 }
  0x47   :  { %v1349_v59 = vsel %vm782_vm2, %v1347_v56, %v1344_v57  ;;  %v1388_v4 = vld [vmem:[#allocation1 + $0x3] ss:$16 sm:%s1387_s20]   ;;  %v1385_v6 = vsel %vm774_vm0, %v1383_v3, %v1380_v1  ;;  %1441 = vrot.lane.b32.xlu1 %v1440_v5, %s2416_s4  ;;  %s1493_s18 = smov 3  ;;  %s1496_s19 = smov 12 }
  0x48   :  { %v2360_v62 = vpack.i.bf16 %v1349_v59, %v1326_v53  ;;  %v1393_v7 = vld [vmem:[#allocation1 + $0x3] ss:$16 sm:%s1392_s21]   ;;  %v1390_v9 = vsel %vm778_vm1, %v1388_v4, %v1385_v6  ;;  %v1494_v16 = vld [vmem:[#allocation1 + $0x108] ss:$16 sm:%s1493_s18]   ;;  %s1501_s23 = smov 48  ;;  %s1506_s24 = smov 192 }
  0x49   :  { %v1402_v8 = vld [vmem:[#allocation1 + $0x103] ss:$16 sm:%s1401_s22]   ;;  %v1395_v12 = vsel %vm782_vm2, %v1393_v7, %v1390_v9  ;;  %v1497_v17 = vld [vmem:[#allocation1 + $0x108] ss:$16 sm:%s1496_s19]   ;;  %s1447_s27 = smov 3  ;;  %s1450_s28 = smov 12 }
  0x4a   :  { %2361 = vrot.lane.b32.xlu0 %v2360_v62, %s2415_s0  ;;  %v1405_v10 = vld [vmem:[#allocation1 + $0x103] ss:$16 sm:%s1404_s25]   ;;  %v1499_v19 = vsel %vm774_vm0, %v1497_v17, %v1494_v16  ;;  %v1502_v20 = vld [vmem:[#allocation1 + $0x108] ss:$16 sm:%s1501_s23]   ;;  %s1455_s29 = smov 48  ;;  %s1460_s30 = smov 192 }
  0x4b   :  { %v1410_v11 = vld [vmem:[#allocation1 + $0x103] ss:$16 sm:%s1409_s26]   ;;  %v1407_v13 = vsel %vm774_vm0, %v1405_v10, %v1402_v8  ;;  %v1507_v21 = vld [vmem:[#allocation1 + $0x108] ss:$16 sm:%s1506_s24]   ;;  %v1504_v23 = vsel %vm778_vm1, %v1502_v20, %v1499_v19  ;;  %s1470_s2 = smov 3  ;;  %s1473_s3 = smov 12 }
  0x4c   :  { %v1415_v14 = vld [vmem:[#allocation1 + $0x103] ss:$16 sm:%s1414_s11]   ;;  %v1412_v15 = vsel %vm778_vm1, %v1410_v11, %v1407_v13  ;;  %v1448_v24 = vld [vmem:[#allocation1 + $0x88] ss:$16 sm:%s1447_s27]   ;;  %v1509_v26 = vsel %vm782_vm2, %v1507_v21, %v1504_v23  ;;  %s2417_s5 = smov 64   ;;  %s1478_s6 = smov 48 }
  0x4d   :  { %v1417_v18 = vsel %vm782_vm2, %v1415_v14, %v1412_v15  ;;  %v1451_v25 = vld [vmem:[#allocation1 + $0x88] ss:$16 sm:%s1450_s28]   ;;  %1510 = vrot.lane.b32.xlu1 %v1509_v26, %s2417_s5  ;;  %s1483_s7 = smov 192  ;;  %s1562_s8 = smov 3 }
  0x4e   :  { %v2365_v22 = vpack.i.bf16 %v1417_v18, %v1395_v12  ;;  %v1453_v27 = vsel %vm774_vm0, %v1451_v25, %v1448_v24  ;;  %v1456_v28 = vld [vmem:[#allocation1 + $0x88] ss:$16 sm:%s1455_s29]   ;;  %v1563_v38 = vld [vmem:[#allocation1 + $0xd] ss:$16 sm:%s1562_s8]   ;;  %s1565_s0 = smov 12  ;;  %s1570_s9 = smov 48 }
  0x4f   :  { %v1461_v29 = vld [vmem:[#allocation1 + $0x88] ss:$16 sm:%s1460_s30]   ;;  %v1458_v30 = vsel %vm778_vm1, %v1456_v28, %v1453_v27  ;;  %v1566_v40 = vld [vmem:[#allocation1 + $0xd] ss:$16 sm:%s1565_s0]   ;;  %s1575_s10 = smov 192  ;;  %s1516_s12 = smov 3 }
  0x50   :  { %2366 = vrot.lane.b32.xlu0 %v2365_v22, %s2416_s4  ;;  %v1471_v31 = vld [vmem:[#allocation1 + $0x8] ss:$16 sm:%s1470_s2]   ;;  %v1463_v33 = vsel %vm782_vm2, %v1461_v29, %v1458_v30  ;;  %v1571_v41 = vld [vmem:[#allocation1 + $0xd] ss:$16 sm:%s1570_s9]   ;;  %v1568_v43 = vsel %vm774_vm0, %v1566_v40, %v1563_v38  ;;  %s1519_s13 = smov 12  ;;  %s1524_s14 = smov 48 }
  0x51   :  { %v1474_v32 = vld [vmem:[#allocation1 + $0x8] ss:$16 sm:%s1473_s3]   ;;  %v1576_v44 = vld [vmem:[#allocation1 + $0xd] ss:$16 sm:%s1575_s10]   ;;  %v1573_v46 = vsel %vm778_vm1, %v1571_v41, %v1568_v43  ;;  %s1529_s15 = smov 192  ;;  %s1539_s16 = smov 3 }
  0x52   :  { %v1476_v34 = vsel %vm774_vm0, %v1474_v32, %v1471_v31  ;;  %v1479_v35 = vld [vmem:[#allocation1 + $0x8] ss:$16 sm:%s1478_s6]   ;;  %v1517_v45 = vld [vmem:[#allocation1 + $0x10d] ss:$16 sm:%s1516_s12]   ;;  %v1578_v49 = vsel %vm782_vm2, %v1576_v44, %v1573_v46  ;;  %s1542_s17 = smov 12  ;;  %s1547_s20 = smov 48 }
  0x53   :  { %v1484_v36 = vld [vmem:[#allocation1 + $0x8] ss:$16 sm:%s1483_s7]   ;;  %v1481_v37 = vsel %vm778_vm1, %v1479_v35, %v1476_v34  ;;  %v1520_v47 = vld [vmem:[#allocation1 + $0x10d] ss:$16 sm:%s1519_s13]   ;;  %s2418_s21 = smov 56   ;;  %s1552_s22 = smov 192 }
  0x54   :  { %v1486_v39 = vsel %vm782_vm2, %v1484_v36, %v1481_v37  ;;  %v1525_v48 = vld [vmem:[#allocation1 + $0x10d] ss:$16 sm:%s1524_s14]   ;;  %v1522_v50 = vsel %vm774_vm0, %v1520_v47, %v1517_v45  ;;  %1579 = vrot.lane.b32.xlu1 %v1578_v49, %s2418_s21  ;;  %s1630_s25 = smov 3  ;;  %s1633_s26 = smov 12 }
  0x55   :  { %v2370_v42 = vpack.i.bf16 %v1486_v39, %v1463_v33  ;;  %v1530_v51 = vld [vmem:[#allocation1 + $0x10d] ss:$16 sm:%s1529_s15]   ;;  %v1527_v53 = vsel %vm778_vm1, %v1525_v48, %v1522_v50  ;;  %v1631_v60 = vld [vmem:[#allocation1 + $0x82] ss:$16 sm:%s1630_s25]   ;;  %s1638_s4 = smov 48  ;;  %s1643_s11 = smov 192 }
  0x56   :  { %v1540_v52 = vld [vmem:[#allocation1 + $0x8d] ss:$16 sm:%s1539_s16]   ;;  %v1532_v56 = vsel %vm782_vm2, %v1530_v51, %v1527_v53  ;;  %v1634_v61 = vld [vmem:[#allocation1 + $0x82] ss:$16 sm:%s1633_s26]   ;;  %s1585_s18 = smov 3  ;;  %s1588_s19 = smov 12 }
  0x57   :  { %2371 = vrot.lane.b32.xlu0 %v2370_v42, %s2417_s5  ;;  %v1543_v54 = vld [vmem:[#allocation1 + $0x8d] ss:$16 sm:%s1542_s17]   ;;  %v1636_v63 = vsel %vm774_vm0, %v1634_v61, %v1631_v60  ;;  %v1639_v0 = vld [vmem:[#allocation1 + $0x82] ss:$16 sm:%s1638_s4]   ;;  %s1593_s23 = smov 48  ;;  %s1598_s24 = smov 192 }
  0x58   :  { %v1548_v55 = vld [vmem:[#allocation1 + $0x8d] ss:$16 sm:%s1547_s20]   ;;  %v1545_v57 = vsel %vm774_vm0, %v1543_v54, %v1540_v52  ;;  %v1644_v1 = vld [vmem:[#allocation1 + $0x82] ss:$16 sm:%s1643_s11]   ;;  %v1641_v3 = vsel %vm778_vm1, %v1639_v0, %v1636_v63  ;;  %s1607_s27 = smov 3  ;;  %s1610_s28 = smov 12 }
  0x59   :  { %v1553_v58 = vld [vmem:[#allocation1 + $0x8d] ss:$16 sm:%s1552_s22]   ;;  %v1550_v59 = vsel %vm778_vm1, %v1548_v55, %v1545_v57  ;;  %v1586_v4 = vld [vmem:[#allocation1 + $0x2] ss:$16 sm:%s1585_s18]   ;;  %v1646_v6 = vsel %vm782_vm2, %v1644_v1, %v1641_v3  ;;  %s2419_s29 = smov 48   ;;  %s1615_s30 = smov 48 }
  0x5a   :  { %v1555_v62 = vsel %vm782_vm2, %v1553_v58, %v1550_v59  ;;  %v1589_v5 = vld [vmem:[#allocation1 + $0x2] ss:$16 sm:%s1588_s19]   ;;  %1647 = vrot.lane.b32.xlu1 %v1646_v6, %s2419_s29  ;;  %s1620_s2 = smov 192  ;;  %s1699_s3 = smov 3 }
  0x5b   :  { %v2375_v2 = vpack.i.bf16 %v1555_v62, %v1532_v56  ;;  %v1591_v7 = vsel %vm774_vm0, %v1589_v5, %v1586_v4  ;;  %v1594_v8 = vld [vmem:[#allocation1 + $0x2] ss:$16 sm:%s1593_s23]   ;;  %v1700_v18 = vld [vmem:[#allocation1 + $0x107] ss:$16 sm:%s1699_s3]   ;;  %s1702_s5 = smov 12  ;;  %s1707_s6 = smov 48 }
  0x5c   :  { %v1599_v9 = vld [vmem:[#allocation1 + $0x2] ss:$16 sm:%s1598_s24]   ;;  %v1596_v10 = vsel %vm778_vm1, %v1594_v8, %v1591_v7  ;;  %v1703_v20 = vld [vmem:[#allocation1 + $0x107] ss:$16 sm:%s1702_s5]   ;;  %s1712_s7 = smov 192  ;;  %s1653_s8 = smov 3 }
  0x5d   :  { %2376 = vrot.lane.b32.xlu0 %v2375_v2, %s2418_s21  ;;  %v1608_v11 = vld [vmem:[#allocation1 + $0x102] ss:$16 sm:%s1607_s27]   ;;  %v1601_v13 = vsel %vm782_vm2, %v1599_v9, %v1596_v10  ;;  %v1708_v21 = vld [vmem:[#allocation1 + $0x107] ss:$16 sm:%s1707_s6]   ;;  %v1705_v23 = vsel %vm774_vm0, %v1703_v20, %v1700_v18  ;;  %s1656_s0 = smov 12  ;;  %s1661_s9 = smov 48 }
  0x5e   :  { %v1611_v12 = vld [vmem:[#allocation1 + $0x102] ss:$16 sm:%s1610_s28]   ;;  %v1713_v24 = vld [vmem:[#allocation1 + $0x107] ss:$16 sm:%s1712_s7]   ;;  %v1710_v26 = vsel %vm778_vm1, %v1708_v21, %v1705_v23  ;;  %s1666_s10 = smov 192  ;;  %s1676_s12 = smov 3 }
  0x5f   :  { %v1613_v14 = vsel %vm774_vm0, %v1611_v12, %v1608_v11  ;;  %v1616_v15 = vld [vmem:[#allocation1 + $0x102] ss:$16 sm:%s1615_s30]   ;;  %v1654_v25 = vld [vmem:[#allocation1 + $0x87] ss:$16 sm:%s1653_s8]   ;;  %v1715_v29 = vsel %vm782_vm2, %v1713_v24, %v1710_v26  ;;  %s1679_s13 = smov 12  ;;  %s1684_s14 = smov 48 }
  0x60   :  { %v1621_v16 = vld [vmem:[#allocation1 + $0x102] ss:$16 sm:%s1620_s2]   ;;  %v1618_v17 = vsel %vm778_vm1, %v1616_v15, %v1613_v14  ;;  %v1657_v27 = vld [vmem:[#allocation1 + $0x87] ss:$16 sm:%s1656_s0]   ;;  %s2420_s15 = smov 40   ;;  %s1689_s16 = smov 192 }
  0x61   :  { %v1623_v19 = vsel %vm782_vm2, %v1621_v16, %v1618_v17  ;;  %v1662_v28 = vld [vmem:[#allocation1 + $0x87] ss:$16 sm:%s1661_s9]   ;;  %v1659_v30 = vsel %vm774_vm0, %v1657_v27, %v1654_v25  ;;  %1716 = vrot.lane.b32.xlu1 %v1715_v29, %s2420_s15  ;;  %s1768_s17 = smov 3  ;;  %s1771_s20 = smov 12 }
  0x62   :  { %v2380_v22 = vpack.i.bf16 %v1623_v19, %v1601_v13  ;;  %v1667_v31 = vld [vmem:[#allocation1 + $0x87] ss:$16 sm:%s1666_s10]   ;;  %v1664_v33 = vsel %vm778_vm1, %v1662_v28, %v1659_v30  ;;  %v1769_v40 = vld [vmem:[#allocation1 + $0xc] ss:$16 sm:%s1768_s17]   ;;  %s1776_s21 = smov 48  ;;  %s1781_s22 = smov 192 }
  0x63   :  { %v1677_v32 = vld [vmem:[#allocation1 + $0x7] ss:$16 sm:%s1676_s12]   ;;  %v1669_v36 = vsel %vm782_vm2, %v1667_v31, %v1664_v33  ;;  %v1772_v41 = vld [vmem:[#allocation1 + $0xc] ss:$16 sm:%s1771_s20]   ;;  %s1722_s25 = smov 3  ;;  %s1725_s26 = smov 12 }
  0x64   :  { %2381 = vrot.lane.b32.xlu0 %v2380_v22, %s2419_s29  ;;  %v1680_v34 = vld [vmem:[#allocation1 + $0x7] ss:$16 sm:%s1679_s13]   ;;  %v1774_v43 = vsel %vm774_vm0, %v1772_v41, %v1769_v40  ;;  %v1777_v44 = vld [vmem:[#allocation1 + $0xc] ss:$16 sm:%s1776_s21]   ;;  %s1730_s4 = smov 48  ;;  %s1735_s11 = smov 192 }
  0x65   :  { %v1685_v35 = vld [vmem:[#allocation1 + $0x7] ss:$16 sm:%s1684_s14]   ;;  %v1682_v37 = vsel %vm774_vm0, %v1680_v34, %v1677_v32  ;;  %v1782_v45 = vld [vmem:[#allocation1 + $0xc] ss:$16 sm:%s1781_s22]   ;;  %v1779_v47 = vsel %vm778_vm1, %v1777_v44, %v1774_v43  ;;  %s1745_s18 = smov 3  ;;  %s1748_s19 = smov 12 }
  0x66   :  { %v1690_v38 = vld [vmem:[#allocation1 + $0x7] ss:$16 sm:%s1689_s16]   ;;  %v1687_v39 = vsel %vm778_vm1, %v1685_v35, %v1682_v37  ;;  %v1723_v48 = vld [vmem:[#allocation1 + $0x10c] ss:$16 sm:%s1722_s25]   ;;  %v1784_v50 = vsel %vm782_vm2, %v1782_v45, %v1779_v47  ;;  %s2421_s23 = smov 32   ;;  %s1753_s24 = smov 48 }
  0x67   :  { %v1692_v42 = vsel %vm782_vm2, %v1690_v38, %v1687_v39  ;;  %v1726_v49 = vld [vmem:[#allocation1 + $0x10c] ss:$16 sm:%s1725_s26]   ;;  %1785 = vrot.lane.b32.xlu1 %v1784_v50, %s2421_s23  ;;  %s1758_s27 = smov 192  ;;  %s1836_s28 = smov 3 }
  0x68   :  { %v2385_v46 = vpack.i.bf16 %v1692_v42, %v1669_v36  ;;  %v1728_v51 = vsel %vm774_vm0, %v1726_v49, %v1723_v48  ;;  %v1731_v52 = vld [vmem:[#allocation1 + $0x10c] ss:$16 sm:%s1730_s4]   ;;  %v1837_v62 = vld [vmem:[#allocation1 + $0x81] ss:$16 sm:%s1836_s28]   ;;  %s1839_s29 = smov 12  ;;  %s1844_s30 = smov 48 }
  0x69   :  { %v1736_v53 = vld [vmem:[#allocation1 + $0x10c] ss:$16 sm:%s1735_s11]   ;;  %v1733_v54 = vsel %vm778_vm1, %v1731_v52, %v1728_v51  ;;  %v1840_v0 = vld [vmem:[#allocation1 + $0x81] ss:$16 sm:%s1839_s29]   ;;  %s1849_s2 = smov 192  ;;  %s1791_s3 = smov 3 }
  0x6a   :  { %2386 = vrot.lane.b32.xlu0 %v2385_v46, %s2420_s15  ;;  %v1746_v55 = vld [vmem:[#allocation1 + $0x8c] ss:$16 sm:%s1745_s18]   ;;  %v1738_v57 = vsel %vm782_vm2, %v1736_v53, %v1733_v54  ;;  %v1845_v1 = vld [vmem:[#allocation1 + $0x81] ss:$16 sm:%s1844_s30]   ;;  %v1842_v3 = vsel %vm774_vm0, %v1840_v0, %v1837_v62  ;;  %s1794_s5 = smov 12  ;;  %s1799_s6 = smov 48 }
  0x6b   :  { %v1749_v56 = vld [vmem:[#allocation1 + $0x8c] ss:$16 sm:%s1748_s19]   ;;  %v1850_v4 = vld [vmem:[#allocation1 + $0x81] ss:$16 sm:%s1849_s2]   ;;  %v1847_v6 = vsel %vm778_vm1, %v1845_v1, %v1842_v3  ;;  %s1804_s7 = smov 192  ;;  %s1813_s8 = smov 3 }
  0x6c   :  { %v1751_v58 = vsel %vm774_vm0, %v1749_v56, %v1746_v55  ;;  %v1754_v59 = vld [vmem:[#allocation1 + $0x8c] ss:$16 sm:%s1753_s24]   ;;  %v1792_v5 = vld [vmem:[#allocation1 + $0x1] ss:$16 sm:%s1791_s3]   ;;  %v1852_v9 = vsel %vm782_vm2, %v1850_v4, %v1847_v6  ;;  %s1816_s0 = smov 12  ;;  %s1821_s9 = smov 48 }
  0x6d   :  { %v1759_v60 = vld [vmem:[#allocation1 + $0x8c] ss:$16 sm:%s1758_s27]   ;;  %v1756_v61 = vsel %vm778_vm1, %v1754_v59, %v1751_v58  ;;  %v1795_v7 = vld [vmem:[#allocation1 + $0x1] ss:$16 sm:%s1794_s5]   ;;  %s2422_s10 = smov 24   ;;  %s1826_s12 = smov 192 }
  0x6e   :  { %v1761_v63 = vsel %vm782_vm2, %v1759_v60, %v1756_v61  ;;  %v1800_v8 = vld [vmem:[#allocation1 + $0x1] ss:$16 sm:%s1799_s6]   ;;  %v1797_v10 = vsel %vm774_vm0, %v1795_v7, %v1792_v5  ;;  %1853 = vrot.lane.b32.xlu1 %v1852_v9, %s2422_s10  ;;  %s1905_s13 = smov 3  ;;  %s1908_s14 = smov 12 }
  0x6f   :  { %v2390_v2 = vpack.i.bf16 %v1761_v63, %v1738_v57  ;;  %v1805_v11 = vld [vmem:[#allocation1 + $0x1] ss:$16 sm:%s1804_s7]   ;;  %v1802_v13 = vsel %vm778_vm1, %v1800_v8, %v1797_v10  ;;  %v1906_v20 = vld [vmem:[#allocation1 + $0x106] ss:$16 sm:%s1905_s13]   ;;  %s1913_s15 = smov 48  ;;  %s1918_s16 = smov 192 }
  0x70   :  { %v1814_v12 = vld [vmem:[#allocation1 + $0x101] ss:$16 sm:%s1813_s8]   ;;  %v1807_v16 = vsel %vm782_vm2, %v1805_v11, %v1802_v13  ;;  %v1909_v21 = vld [vmem:[#allocation1 + $0x106] ss:$16 sm:%s1908_s14]   ;;  %s1859_s17 = smov 3  ;;  %s1862_s20 = smov 12 }
  0x71   :  { %2391 = vrot.lane.b32.xlu0 %v2390_v2, %s2421_s23  ;;  %v1817_v14 = vld [vmem:[#allocation1 + $0x101] ss:$16 sm:%s1816_s0]   ;;  %v1911_v23 = vsel %vm774_vm0, %v1909_v21, %v1906_v20  ;;  %v1914_v24 = vld [vmem:[#allocation1 + $0x106] ss:$16 sm:%s1913_s15]   ;;  %s1867_s21 = smov 48  ;;  %s1872_s22 = smov 192 }
  0x72   :  { %v1822_v15 = vld [vmem:[#allocation1 + $0x101] ss:$16 sm:%s1821_s9]   ;;  %v1819_v17 = vsel %vm774_vm0, %v1817_v14, %v1814_v12  ;;  %v1919_v25 = vld [vmem:[#allocation1 + $0x106] ss:$16 sm:%s1918_s16]   ;;  %v1916_v27 = vsel %vm778_vm1, %v1914_v24, %v1911_v23  ;;  %s1882_s25 = smov 3  ;;  %s1885_s26 = smov 12 }
  0x73   :  { %v1827_v18 = vld [vmem:[#allocation1 + $0x101] ss:$16 sm:%s1826_s12]   ;;  %v1824_v19 = vsel %vm778_vm1, %v1822_v15, %v1819_v17  ;;  %v1860_v28 = vld [vmem:[#allocation1 + $0x86] ss:$16 sm:%s1859_s17]   ;;  %v1921_v30 = vsel %vm782_vm2, %v1919_v25, %v1916_v27  ;;  %s2423_s4 = smov 16   ;;  %s1890_s11 = smov 48 }
  0x74   :  { %v1829_v22 = vsel %vm782_vm2, %v1827_v18, %v1824_v19  ;;  %v1863_v29 = vld [vmem:[#allocation1 + $0x86] ss:$16 sm:%s1862_s20]   ;;  %1922 = vrot.lane.b32.xlu1 %v1921_v30, %s2423_s4  ;;  %s1895_s18 = smov 192  ;;  %s1974_s19 = smov 3 }
  0x75   :  { %v2395_v26 = vpack.i.bf16 %v1829_v22, %v1807_v16  ;;  %v1865_v31 = vsel %vm774_vm0, %v1863_v29, %v1860_v28  ;;  %v1868_v32 = vld [vmem:[#allocation1 + $0x86] ss:$16 sm:%s1867_s21]   ;;  %v1975_v42 = vld [vmem:[#allocation1 + $0xb] ss:$16 sm:%s1974_s19]   ;;  %s1977_s23 = smov 12  ;;  %s1982_s24 = smov 48 }
  0x76   :  { %v1873_v33 = vld [vmem:[#allocation1 + $0x86] ss:$16 sm:%s1872_s22]   ;;  %v1870_v34 = vsel %vm778_vm1, %v1868_v32, %v1865_v31  ;;  %v1978_v44 = vld [vmem:[#allocation1 + $0xb] ss:$16 sm:%s1977_s23]   ;;  %s1987_s27 = smov 192  ;;  %s1928_s28 = smov 3 }
  0x77   :  { %2396 = vrot.lane.b32.xlu0 %v2395_v26, %s2422_s10  ;;  %v1883_v35 = vld [vmem:[#allocation1 + $0x6] ss:$16 sm:%s1882_s25]   ;;  %v1875_v37 = vsel %vm782_vm2, %v1873_v33, %v1870_v34  ;;  %v1983_v45 = vld [vmem:[#allocation1 + $0xb] ss:$16 sm:%s1982_s24]   ;;  %v1980_v47 = vsel %vm774_vm0, %v1978_v44, %v1975_v42  ;;  %s1931_s29 = smov 12  ;;  %s1936_s30 = smov 48 }
  0x78   :  { %v1886_v36 = vld [vmem:[#allocation1 + $0x6] ss:$16 sm:%s1885_s26]   ;;  %v1988_v48 = vld [vmem:[#allocation1 + $0xb] ss:$16 sm:%s1987_s27]   ;;  %v1985_v50 = vsel %vm778_vm1, %v1983_v45, %v1980_v47  ;;  %s1941_s2 = smov 192  ;;  %s1951_s3 = smov 3 }
  0x79   :  { %v1888_v38 = vsel %vm774_vm0, %v1886_v36, %v1883_v35  ;;  %v1891_v39 = vld [vmem:[#allocation1 + $0x6] ss:$16 sm:%s1890_s11]   ;;  %v1929_v49 = vld [vmem:[#allocation1 + $0x10b] ss:$16 sm:%s1928_s28]   ;;  %v1990_v53 = vsel %vm782_vm2, %v1988_v48, %v1985_v50  ;;  %s1954_s5 = smov 12  ;;  %s1959_s6 = smov 48 }
  0x7a   :  { %v1896_v40 = vld [vmem:[#allocation1 + $0x6] ss:$16 sm:%s1895_s18]   ;;  %v1893_v41 = vsel %vm778_vm1, %v1891_v39, %v1888_v38  ;;  %v1932_v51 = vld [vmem:[#allocation1 + $0x10b] ss:$16 sm:%s1931_s29]   ;;  %s2424_s7 = smov 8   ;;  %s1964_s8 = smov 192 }
  0x7b   :  { %v1898_v43 = vsel %vm782_vm2, %v1896_v40, %v1893_v41  ;;  %v1937_v52 = vld [vmem:[#allocation1 + $0x10b] ss:$16 sm:%s1936_s30]   ;;  %v1934_v54 = vsel %vm774_vm0, %v1932_v51, %v1929_v49  ;;  %1991 = vrot.lane.b32.xlu1 %v1990_v53, %s2424_s7  ;;  %s770_s0 = smov 3  ;;  %s772_s9 = smov 12 }
  0x7c   :  { %v2400_v46 = vpack.i.bf16 %v1898_v43, %v1875_v37  ;;  %v1942_v55 = vld [vmem:[#allocation1 + $0x10b] ss:$16 sm:%s1941_s2]   ;;  %v1939_v57 = vsel %vm778_vm1, %v1937_v52, %v1934_v54  ;;  %v771_v63 = vld [vmem:[#allocation1] ss:$16 sm:%s770_s0]   ;;  %s776_s10 = smov 48  ;;  %s780_s12 = smov 192 }
  0x7d   :  { %v1952_v56 = vld [vmem:[#allocation1 + $0x8b] ss:$16 sm:%s1951_s3]   ;;  %v1944_v60 = vsel %vm782_vm2, %v1942_v55, %v1939_v57  ;;  %v773_v1 = vld [vmem:[#allocation1] ss:$16 sm:%s772_s9]   ;;  %s808_s13 = smov 3  ;;  %s811_s14 = smov 12 }
  0x7e   :  { %2401 = vrot.lane.b32.xlu0 %v2400_v46, %s2423_s4  ;;  %v1955_v58 = vld [vmem:[#allocation1 + $0x8b] ss:$16 sm:%s1954_s5]   ;;  %v777_v2 = vld [vmem:[#allocation1] ss:$16 sm:%s776_s10]   ;;  %v775_v4 = vsel %vm774_vm0, %v773_v1, %v771_v63  ;;  %s816_s15 = smov 48  ;;  %s821_s16 = smov 192 }
  0x7f   :  { %v1960_v59 = vld [vmem:[#allocation1 + $0x8b] ss:$16 sm:%s1959_s6]   ;;  %v1957_v61 = vsel %vm774_vm0, %v1955_v58, %v1952_v56  ;;  %v781_v5 = vld [vmem:[#allocation1] ss:$16 sm:%s780_s12]   ;;  %v779_v8 = vsel %vm778_vm1, %v777_v2, %v775_v4  ;;  %s787_s17 = smov 3  ;;  %s790_s20 = smov 12 }
  0x80   :  { %v1965_v62 = vld [vmem:[#allocation1 + $0x8b] ss:$16 sm:%s1964_s8]   ;;  %v1962_v0 = vsel %vm778_vm1, %v1960_v59, %v1957_v61  ;;  %v809_v6 = vld [vmem:[#allocation1 + $0x100] ss:$16 sm:%s808_s13]   ;;  %v783_v11 = vsel %vm782_vm2, %v781_v5, %v779_v8  ;;  %s795_s21 = smov 48  ;;  %s800_s22 = smov 192 }
  0x81   :  { %v1967_v3 = vsel %vm782_vm2, %v1965_v62, %v1962_v0  ;;  %v812_v9 = vld [vmem:[#allocation1 + $0x100] ss:$16 sm:%s811_s14]   ;;  %785 = vst.msk [vmem:[#allocation0] sm:$0xff] %vm784_vm5, %v783_v11  }
  0x82   :  { %v2405_v7 = vpack.i.bf16 %v1967_v3, %v1944_v60  ;;  %v817_v10 = vld [vmem:[#allocation1 + $0x100] ss:$16 sm:%s816_s15]   ;;  %v814_v12 = vsel %vm774_vm0, %v812_v9, %v809_v6 }
  0x83   :  { %v822_v13 = vld [vmem:[#allocation1 + $0x100] ss:$16 sm:%s821_s16]   ;;  %v819_v15 = vsel %vm778_vm1, %v817_v10, %v814_v12 }
  0x84   :  { %v788_v14 = vld [vmem:[#allocation1 + $0x80] ss:$16 sm:%s787_s17]   ;;  %2406 = vrot.lane.b32.xlu0 %v2405_v7, %s2424_s7  ;;  %v824_v18 = vsel %vm782_vm2, %v822_v13, %v819_v15 }
  0x85   :  { %v791_v16 = vld [vmem:[#allocation1 + $0x80] ss:$16 sm:%s790_s20]   ;;  %827 = vst.msk [vmem:[#allocation0 + $0x30] sm:$0xff] %vm784_vm5, %v824_v18  }
  0x86   :  { %v796_v17 = vld [vmem:[#allocation1 + $0x80] ss:$16 sm:%s795_s21]   ;;  %v793_v19 = vsel %vm774_vm0, %v791_v16, %v788_v14  ;;  %vm1672_vm0 = vcmask 523584  }
  0x87   :  { %v801_v20 = vld [vmem:[#allocation1 + $0x80] ss:$16 sm:%s800_s22]   ;;  %v798_v21 = vsel %vm778_vm1, %v796_v17, %v793_v19  ;;  %vm1741_vm1 = vcmask 457984  }
  0x88   :  { %v803_v22 = vsel %vm782_vm2, %v801_v20, %v798_v21  ;;  %v1168_v23 = vpop.permute.xlu1 %1167   ;;  %vm1810_vm2 = vcmask 392384  }
  0x89   :  { %806 = vst.msk [vmem:[#allocation0 + $0x18] sm:$0xff] %vm784_vm5, %v803_v22  }
  0x93   :  { %v2337_v24 = vpop.permute.xlu0 %2336 }
  0x94   :  { %v2339_v30 = vunpack.i.h.bf16 %v2337_v24  ;;  %v2338_v31 = vunpack.i.l.bf16 %v2337_v24 }
  0x95   :  { %v1236_v25 = vpop.permute.xlu1 %1235  }
  0x9b   :  { %v2342_v26 = vpop.permute.xlu0 %2341 }
  0x9c   :  { %v2344_v35 = vunpack.i.h.bf16 %v2342_v26  ;;  %v2343_v36 = vunpack.i.l.bf16 %v2342_v26 }
  0x9f   :  { %v2357_v27 = vpop.permute.xlu1 %2356 }
  0xa0   :  { %v2359_v28 = vunpack.i.h.bf16 %v2357_v27  ;;  %v2358_v29 = vunpack.i.l.bf16 %v2357_v27 }
  0xa2   :  { %1053 = vst.msk [vmem:[#allocation0 + $0x28] sm:$0xff] %vm864_vm4, %v2359_v28   ;;  %1007 = vst.msk [vmem:[#allocation0 + $0x40] sm:$0xff] %vm864_vm4, %v2358_v29  }
  0xa3   :  { %1148 = vst.msk [vmem:[#allocation0 + $0x28] sm:$0xff] %vm1123_vm6, %v2339_v30   ;;  %1125 = vst.msk [vmem:[#allocation0 + $0x40] sm:$0xff] %vm1123_vm6, %v2338_v31  }
  0xa7   :  { %v2347_v32 = vpop.permute.xlu0 %2346 }
  0xa8   :  { %v2349_v33 = vunpack.i.h.bf16 %v2347_v32  ;;  %v2348_v34 = vunpack.i.l.bf16 %v2347_v32  ;;  %v1096_v37 = vpop.permute.xlu1 %1095   ;;  %v2425_v32 = vmov 0.0  }
  0xa9   :  { %1099 = vst.msk [vmem:[#allocation0 + $0x10] sm:$0xff] %vm864_vm4, %v1096_v37   ;;  %vm1947_vm4 = vcmask 261184  }
  0xaa   :  { %915 = vst.msk [vmem:[#allocation0 + $0x8] sm:$0xff] %vm868_vm3, %v2349_v33   ;;  %870 = vst.msk [vmem:[#allocation0 + $0x20] sm:$0xff] %vm868_vm3, %v2348_v34  }
  0xab   :  { %872 = vst.msk [vmem:[#allocation0] sm:$0xff] %vm871_vm7, %v2348_v34   ;;  %918 = vst.msk [vmem:[#allocation0 + $0x30] sm:$0xff] %vm871_vm7, %v2349_v33  }
  0xac   :  { %1056 = vst.msk [vmem:[#allocation0 + $0x8] sm:$0xff] %vm1008_vm9, %v2359_v28   ;;  %1010 = vst.msk [vmem:[#allocation0 + $0x20] sm:$0xff] %vm1008_vm9, %v2358_v29   ;;  %v1305_v39 = vpop.permute.xlu1 %1304  }
  0xad   :  { %1193 = vst.msk [vmem:[#allocation0] sm:$0xff] %vm1192_vm8, %v2343_v36   ;;  %1216 = vst.msk [vmem:[#allocation0 + $0x30] sm:$0xff] %vm1192_vm8, %v2344_v35   ;;  %v958_v38 = vpop.permute.xlu0 %957  }
  0xae   :  { %1171 = vst.msk [vmem:[#allocation0 + $0x10] sm:$0xff] %vm1123_vm6, %v1168_v23  }
  0xaf   :  { %961 = vst.msk [vmem:[#allocation0 + $0x38] sm:$0xff] %vm868_vm3, %v958_v38   ;;  %vm1878_vm3 = vcmask 326784  }
  0xb0   :  { %964 = vst.msk [vmem:[#allocation0 + $0x18] sm:$0xff] %vm871_vm7, %v958_v38  }
  0xb1   :  { %1102 = vst.msk [vmem:[#allocation0 + $0x38] sm:$0xff] %vm1008_vm9, %v1096_v37  }
  0xb2   :  { %1239 = vst.msk [vmem:[#allocation0 + $0x18] sm:$0xff] %vm1192_vm8, %v1236_v25   ;;  %v1374_v41 = vpop.permute.xlu1 %1373  }
  0xb3   :  { %1308 = vst.msk [vmem:[#allocation0 + $0x38] sm:$0xff] %vm1260_vm10, %v1305_v39  }
  0xb4   :  { %1377 = vst.msk [vmem:[#allocation0 + $0x10] sm:$0xff] %vm1329_vm11, %v1374_v41  }
  0xb5   :  { %v2352_v40 = vpop.permute.xlu0 %2351 }
  0xb6   :  { %v2354_v42 = vunpack.i.h.bf16 %v2352_v40  ;;  %v2353_v43 = vunpack.i.l.bf16 %v2352_v40 }
  0xb8   :  { %1262 = vst.msk [vmem:[#allocation0 + $0x20] sm:$0xff] %vm1260_vm10, %v2353_v43   ;;  %1285 = vst.msk [vmem:[#allocation0 + $0x8] sm:$0xff] %vm1260_vm10, %v2354_v42  }
  0xb9   :  { %v1442_v47 = vpop.permute.xlu1 %1441  }
  0xba   :  { %1445 = vst.msk [vmem:[#allocation0 + $0x18] sm:$0xff] %vm1398_vm12, %v1442_v47  }
  0xbc   :  { %v2362_v44 = vpop.permute.xlu0 %2361 }
  0xbd   :  { %v2364_v45 = vunpack.i.h.bf16 %v2362_v44  ;;  %v2363_v46 = vunpack.i.l.bf16 %v2362_v44 }
  0xbf   :  { %1354 = vst.msk [vmem:[#allocation0 + $0x28] sm:$0xff] %vm1329_vm11, %v2364_v45   ;;  %1331 = vst.msk [vmem:[#allocation0 + $0x40] sm:$0xff] %vm1329_vm11, %v2363_v46   ;;  %v1511_v49 = vpop.permute.xlu1 %1510  }
  0xc0   :  { %1514 = vst.msk [vmem:[#allocation0 + $0x38] sm:$0xff] %vm1466_vm13, %v1511_v49  }
  0xc2   :  { %v2367_v48 = vpop.permute.xlu0 %2366 }
  0xc3   :  { %v2369_v50 = vunpack.i.h.bf16 %v2367_v48  ;;  %v2368_v51 = vunpack.i.l.bf16 %v2367_v48 }
  0xc5   :  { %1399 = vst.msk [vmem:[#allocation0] sm:$0xff] %vm1398_vm12, %v2368_v51   ;;  %1422 = vst.msk [vmem:[#allocation0 + $0x30] sm:$0xff] %vm1398_vm12, %v2369_v50  }
  0xc6   :  { %v1580_v55 = vpop.permute.xlu1 %1579  }
  0xc7   :  { %1583 = vst.msk [vmem:[#allocation0 + $0x10] sm:$0xff] %vm1535_vm14, %v1580_v55  }
  0xc9   :  { %v2372_v52 = vpop.permute.xlu0 %2371 }
  0xca   :  { %v2374_v53 = vunpack.i.h.bf16 %v2372_v52  ;;  %v2373_v54 = vunpack.i.l.bf16 %v2372_v52 }
  0xcc   :  { %1468 = vst.msk [vmem:[#allocation0 + $0x20] sm:$0xff] %vm1466_vm13, %v2373_v54   ;;  %1491 = vst.msk [vmem:[#allocation0 + $0x8] sm:$0xff] %vm1466_vm13, %v2374_v53   ;;  %v1648_v57 = vpop.permute.xlu1 %1647  }
  0xcd   :  { %1651 = vst.msk [vmem:[#allocation0 + $0x18] sm:$0xff] %vm1604_vm15, %v1648_v57  }
  0xcf   :  { %v2377_v56 = vpop.permute.xlu0 %2376 }
  0xd0   :  { %v2379_v58 = vunpack.i.h.bf16 %v2377_v56  ;;  %v2378_v59 = vunpack.i.l.bf16 %v2377_v56 }
  0xd2   :  { %1537 = vst.msk [vmem:[#allocation0 + $0x40] sm:$0xff] %vm1535_vm14, %v2378_v59   ;;  %1560 = vst.msk [vmem:[#allocation0 + $0x28] sm:$0xff] %vm1535_vm14, %v2379_v58  }
  0xd3   :  { %v1717_v63 = vpop.permute.xlu1 %1716  }
  0xd4   :  { %1720 = vst.msk [vmem:[#allocation0 + $0x38] sm:$0xff] %vm1672_vm0, %v1717_v63  }
  0xd6   :  { %v2382_v60 = vpop.permute.xlu0 %2381 }
  0xd7   :  { %v2384_v61 = vunpack.i.h.bf16 %v2382_v60  ;;  %v2383_v62 = vunpack.i.l.bf16 %v2382_v60 }
  0xd9   :  { %1605 = vst.msk [vmem:[#allocation0] sm:$0xff] %vm1604_vm15, %v2383_v62   ;;  %1628 = vst.msk [vmem:[#allocation0 + $0x30] sm:$0xff] %vm1604_vm15, %v2384_v61   ;;  %v1786_v1 = vpop.permute.xlu1 %1785  }
  0xda   :  { %1789 = vst.msk [vmem:[#allocation0 + $0x10] sm:$0xff] %vm1741_vm1, %v1786_v1  }
  0xdc   :  { %v2387_v0 = vpop.permute.xlu0 %2386 }
  0xdd   :  { %v2389_v2 = vunpack.i.h.bf16 %v2387_v0  ;;  %v2388_v3 = vunpack.i.l.bf16 %v2387_v0 }
  0xdf   :  { %1674 = vst.msk [vmem:[#allocation0 + $0x20] sm:$0xff] %vm1672_vm0, %v2388_v3   ;;  %1697 = vst.msk [vmem:[#allocation0 + $0x8] sm:$0xff] %vm1672_vm0, %v2389_v2  }
  0xe0   :  { %v1854_v7 = vpop.permute.xlu1 %1853  }
  0xe1   :  { %1857 = vst.msk [vmem:[#allocation0 + $0x18] sm:$0xff] %vm1810_vm2, %v1854_v7  }
  0xe3   :  { %v2392_v4 = vpop.permute.xlu0 %2391 }
  0xe4   :  { %v2394_v5 = vunpack.i.h.bf16 %v2392_v4  ;;  %v2393_v6 = vunpack.i.l.bf16 %v2392_v4 }
  0xe6   :  { %1743 = vst.msk [vmem:[#allocation0 + $0x40] sm:$0xff] %vm1741_vm1, %v2393_v6   ;;  %1766 = vst.msk [vmem:[#allocation0 + $0x28] sm:$0xff] %vm1741_vm1, %v2394_v5   ;;  %v1923_v9 = vpop.permute.xlu1 %1922  }
  0xe7   :  { %1926 = vst.msk [vmem:[#allocation0 + $0x38] sm:$0xff] %vm1878_vm3, %v1923_v9  }
  0xe8   :  { %v2022_v22 = vld [vmem:[#allocation0 + $0x18] sm:$0xff] }
  0xe9   :  { %v2397_v8 = vpop.permute.xlu0 %2396 }
  0xea   :  { %v2399_v10 = vunpack.i.h.bf16 %v2397_v8  ;;  %v2398_v11 = vunpack.i.l.bf16 %v2397_v8 }
  0xec   :  { %1811 = vst.msk [vmem:[#allocation0] sm:$0xff] %vm1810_vm2, %v2398_v11   ;;  %1834 = vst.msk [vmem:[#allocation0 + $0x30] sm:$0xff] %vm1810_vm2, %v2399_v10  }
  0xed   :  { %v1992_v15 = vpop.permute.xlu1 %1991  }
  0xee   :  { %v2054_v16 = vld [vmem:[#allocation0 + $0x38] sm:$0xff]  ;;  %1995 = vst.msk [vmem:[#allocation0 + $0x10] sm:$0xff] %vm1947_vm4, %v1992_v15  }
  0xf0   :  { %v2402_v12 = vpop.permute.xlu0 %2401 }
  0xf1   :  { %v2404_v13 = vunpack.i.h.bf16 %v2402_v12  ;;  %v2403_v14 = vunpack.i.l.bf16 %v2402_v12 }
  0xf3   :  { %1880 = vst.msk [vmem:[#allocation0 + $0x20] sm:$0xff] %vm1878_vm3, %v2403_v14   ;;  %1903 = vst.msk [vmem:[#allocation0 + $0x8] sm:$0xff] %vm1878_vm3, %v2404_v13   ;;  %v2046_v17 = vld [vmem:[#allocation0 + $0x30] sm:$0xff]  ;;  %v2001_v24 = vld [vmem:[#allocation0] sm:$0xff] }
  0xf4   :  { %v2291_v18 = vpack.c.bf16 %v2054_v16, %v2046_v17 }
  0xf5   :  { %v2014_v23 = vld [vmem:[#allocation0 + $0x10] sm:$0xff] }
  0xf6   :  { %2318 = vst [vmem:[%s2834_s1 + $0x18] sm:$0xff] %v2291_v18   ;;  %v2407_v19 = vpop.permute.xlu0 %2406  ;;  %v2281_v26 = vpack.c.bf16 %v2022_v22, %v2014_v23 }
  0xf7   :  { %v2409_v20 = vunpack.i.h.bf16 %v2407_v19  ;;  %v2408_v21 = vunpack.i.l.bf16 %v2407_v19 }
  0xf8   :  { %2316 = vst [vmem:[%s2834_s1 + $0x8] sm:$0xff] %v2281_v26  }
  0xf9   :  { %1949 = vst.msk [vmem:[#allocation0 + $0x40] sm:$0xff] %vm1947_vm4, %v2408_v21   ;;  %1972 = vst.msk [vmem:[#allocation0 + $0x28] sm:$0xff] %vm1947_vm4, %v2409_v20  }
  0xfa   :  { %v2007_v25 = vld [vmem:[#allocation0 + $0x8] sm:$0xff]  ;;  %v2030_v28 = vld [vmem:[#allocation0 + $0x20] sm:$0xff] }
  0xfb   :  { %v2276_v27 = vpack.c.bf16 %v2007_v25, %v2001_v24 }
  0xfd   :  { %2277 = vst [vmem:[%s2834_s1] sm:$0xff] %v2276_v27  }
 0x100   :  { %v2038_v29 = vld [vmem:[#allocation0 + $0x28] sm:$0xff]  ;;  %v2062_v30 = vld [vmem:[#allocation0 + $0x40] sm:$0xff] }
 0x101   :  { %v2286_v31 = vpack.c.bf16 %v2038_v29, %v2030_v28  ;;  %v2063_v33 = vpack.c.bf16 %v2425_v32, %v2062_v30 }
 0x103   :  { %2317 = vst [vmem:[%s2834_s1 + $0x10] sm:$0xff] %v2286_v31   ;;  %2176 = vst [vmem:[%s2834_s1 + $0x20] sm:$0xf] %v2063_v33 }

// kernel: bilinear_block.1
= control target key start
LH: loop header
LB: loop body
LE: loop exit
PB: predicated region body
PF: predicated region fallthrough
CT: control target
= control target key end

     0   :  { %v778_v1 = vmov 0.0   ;;  %vm779_vm0 = vmmov 0   ;;  %v780_v5 = vmov 0   ;;  %vm193_vm1 = vcmask 1043456   ;;  %s960_s0 = inlined_call_operand.vmem [shape: f32[16,32], index: 0, kind: input, shape index: {}]   ;;  %s961_s1 = inlined_call_operand.vmem [shape: f32[16,24], index: 1, kind: input, shape index: {}]   ;;  %s962_s2 = inlined_call_operand.vmem [shape: bf16[32,384], index: 2, kind: input, shape index: {}]   ;;  %s963_s3 = inlined_call_operand.vmem [shape: bf16[24,384], index: 3, kind: input, shape index: {}]   ;;  %s964_s4 = inlined_call_operand.vmem [shape: bf16[384,16], index: 4, kind: input, shape index: {}]   ;;  %s965_s5 = inlined_call_operand.vmem [shape: f32[1,16], index: 5, kind: input, shape index: {}]   ;;  %s966_s6 = inlined_call_operand.hbm [shape: f32[16,16], index: 6, kind: output, shape index: {}]  }
   0x1   :  { %v717_v0 = vld [vmem:[%s962_s2 + $0x1c] ss:$12 sps:$4 sm:$0xff]   ;;  %675 = vmatprep.subr.bf16.mxu1 %v778_v1  ;;  %v719_v2 = vld [vmem:[%s962_s2 + $0x20] ss:$12 sps:$4 sm:$0xff]   ;;  %679 = vmatprep.mubr.msk.bf16.mxu1 %vm779_vm0, %v778_v1  ;;  %v720_v3 = vld [vmem:[%s962_s2 + $0x18] ss:$12 sps:$4 sm:$0xff]  }
   0x2   :  { %86 = vmatprep.subr.bf16.mxu0 %v717_v0  ;;  %676 = vmatpush3.bf16.msra.mxu1 %v719_v2  ;;  %v721_v4 = vld [vmem:[%s962_s2 + $0x4] ss:$12 sps:$4 sm:$0xff]   ;;  %v723_v6 = vld [vmem:[%s962_s2 + $0x8] ss:$12 sps:$4 sm:$0xff]   ;;  %v724_v7 = vld [vmem:[%s962_s2] ss:$12 sps:$4 sm:$0xff]  }
   0x3   :  { %106 = vmatprep.mubr.bf16.mxu0 %v780_v5  ;;  %87 = vmatpush1.bf16.msra.mxu0 %v720_v3  ;;  %v25_v8 = vld [vmem:[%s960_s0] sm:$0xff]  ;;  %v26_v9 = vld [vmem:[%s960_s0 + $0x8] sm:$0xff]  ;;  %v163_v10 = vld [vmem:[%s963_s3 + $0x18] sm:$0xff]  ;;  %vm70_vm2 = vcmask 261120   ;;  %vm189_vm3 = vcmask 195584  }
   0x4   :  { %677 = vmatprep.subr.bf16.mxu1 %v778_v1  ;;  %88 = vmatprep.subr.bf16.mxu0 %v721_v4  ;;  %v29_v11 = vpack.c.bf16 %v26_v9, %v25_v8  ;;  %v608_v12 = vcombine.high %v163_v10, %v163_v10  ;;  %v726_v13 = vld [vmem:[%s963_s3 + $0x20] ss:$0 sps:$4 sm:$0xff]   ;;  %v607_v14 = vcombine.low %v163_v10, %v163_v10  ;;  %v730_v16 = vld [vmem:[%s963_s3 + $0x4] ss:$12 sps:$4 sm:$0xff]   ;;  %v731_v18 = vld [vmem:[%s963_s3 + $0x8] ss:$12 sps:$4 sm:$0xff]  }
   0x5   :  { %v201_v15 = vsel %vm193_vm1, %v726_v13, 0  ;;  %v27_v19 = vld [vmem:[%s961_s1] sm:$0xff]  ;;  %v28_v20 = vld [vmem:[%s961_s1 + $0x8] sm:$0xff]  ;;  %v733_v22 = vld [vmem:[%s964_s4 + $0x78] sm:$0xff]  }
   0x6   :  { %678 = vmatpush3.bf16.msra.mxu1 %v723_v6  ;;  %v195_v17 = vsel %vm193_vm1, %v607_v14, 0  ;;  %v728_v21 = vld [vmem:[%s963_s3] ss:$12 sps:$4 sm:$0xff]   ;;  %v158_v23 = vpack.c.bf16 %v28_v20, %v27_v19  ;;  %v732_v24 = vld [vmem:[%s964_s4 + $0xb8] sm:$0xff]   ;;  %v735_v26 = vld [vmem:[%s964_s4 + $0xb0] sm:$0xff]  }
   0x7   :  { %89 = vmatpush1.bf16.msra.mxu0 %v724_v7  ;;  %683 = vmatprep.subr.bf16.mxu1 %v778_v1  ;;  %v734_v25 = vld [vmem:[%s964_s4 + $0x38] sm:$0xff]   ;;  %v736_v27 = vld [vmem:[%s964_s4 + $0x70] sm:$0xff]   ;;  %v739_v29 = vld [vmem:[%s964_s4 + $0x68] sm:$0xff]  }
   0x8   :  { %610 = vmatprep.subr.msk.bf16.mxu0 %vm193_vm1, %v608_v12  ;;  %v737_v28 = vld [vmem:[%s964_s4 + $0x30] sm:$0xff]   ;;  %v738_v30 = vld [vmem:[%s964_s4 + $0xa8] sm:$0xff]   ;;  %v741_v32 = vld [vmem:[%s964_s4 + $0xa0] sm:$0xff]  }
   0x9   :  { %680 = vmatmul.mubr.msk.bf16.vlgmr.msra.gmra.mxu1 %vm70_vm2, %v29_v11  ;;  %v740_v31 = vld [vmem:[%s964_s4 + $0x28] sm:$0xff]  }
   0xa   :  { %602 = vmatmul.mubr.msk.bf16.vlgmr.msra.gmra.mxu0 %vm70_vm2, %v29_v11  ;;  %684 = vmatpush3.bf16.msra.mxu1 %v201_v15 }
   0xb   :  { %216 = vmatpush1.bf16.msra.mxu0 %v195_v17  ;;  %685 = vmatprep.subr.bf16.mxu1 %v778_v1 }
   0xc   :  { %217 = vmatprep.subr.bf16.mxu0 %v730_v16  ;;  %687 = vmatprep.mubr.msk.bf16.mxu1 %vm779_vm0, %v778_v1 }
   0xd   :  { %235 = vmatprep.mubr.bf16.mxu0 %v780_v5 }
   0xe   :  { %686 = vmatpush3.bf16.msra.mxu1 %v731_v18 }
   0xf   :  { %218 = vmatpush1.bf16.msra.mxu0 %v728_v21  ;;  %691 = vmatprep.subr.bf16.mxu1 %v778_v1 }
  0x10   :  { %644 = vmatprep.subr.bf16.mxu0 %v733_v22 }
  0x11   :  { %688 = vmatmul.mubr.msk.bf16.vlgmr.msra.gmra.mxu1 %vm189_vm3, %v158_v23 }
  0x12   :  { %611 = vmatmul.mubr.msk.bf16.vlgmr.msra.gmra.mxu0 %vm189_vm3, %v158_v23  ;;  %692 = vmatpush3.bf16.msra.mxu1 %v732_v24 }
  0x13   :  { %693 = vmatprep.subr.bf16.mxu1 %v778_v1  ;;  %645 = vmatpush3.bf16.msra.mxu0 %v734_v25 }
  0x14   :  { %646 = vmatprep.subr.bf16.mxu0 %v736_v27  ;;  %707 = vmatprep.mubr.msk.bf16.mxu1 %vm779_vm0, %v778_v1 }
  0x16   :  { %694 = vmatpush3.bf16.msra.mxu1 %v735_v26 }
  0x17   :  { %695 = vmatprep.subr.bf16.mxu1 %v778_v1  ;;  %647 = vmatpush3.bf16.msra.mxu0 %v737_v28 }
  0x18   :  { %648 = vmatprep.subr.bf16.mxu0 %v739_v29 }
  0x1a   :  { %696 = vmatpush3.bf16.msra.mxu1 %v738_v30 }
  0x1b   :  { %697 = vmatprep.subr.bf16.mxu1 %v778_v1  ;;  %649 = vmatpush3.bf16.msra.mxu0 %v740_v31 }
  0x1c   :  { %11 = vsyncpa [#allocation3], 0  ;;  %v742_v33 = vld [vmem:[%s964_s4 + $0x60] sm:$0xff]   ;;  %v744_v35 = vld [vmem:[%s964_s4 + $0x98] sm:$0xff]   ;;  %vm577_vm4 = vcmask 130048   ;;  %s781_s18 = smov [#allocation2]  }
  0x1d   :  { %v743_v34 = vld [vmem:[%s964_s4 + $0x20] sm:$0xff]   ;;  %650 = vmatprep.subr.bf16.mxu0 %v742_v33  ;;  %v745_v36 = vld [vmem:[%s964_s4 + $0x58] sm:$0xff]   ;;  %v747_v38 = vld [vmem:[%s964_s4 + $0x90] sm:$0xff]   ;;  %s585_s19 = sshll.u32 %s781_s18, 4  ;;  %s586_s19 = int_to_ptr.vmem [resolvable:$true] %s585_s19 }
  0x1e   :  { %698 = vmatpush3.bf16.msra.mxu1 %v741_v32  ;;  %v746_v37 = vld [vmem:[%s964_s4 + $0x18] sm:$0xff]   ;;  %v748_v39 = vld [vmem:[%s964_s4 + $0x50] sm:$0xff]   ;;  %v750_v41 = vld [vmem:[%s964_s4 + $0x88] sm:$0xff]   ;;  %s756_s20 = scalar_lea.vmem %s586_s19, 256  ;;  %p761_p1 = scmp.lt.s32.totalorder %s586_s19, %s586_s19 }
  0x1f   :  { %699 = vmatprep.subr.bf16.mxu1 %v778_v1  ;;  %651 = vmatpush3.bf16.msra.mxu0 %v743_v34  ;;  %v749_v40 = vld [vmem:[%s964_s4 + $0x10] sm:$0xff]   ;;  %v751_v42 = vld [vmem:[%s964_s4 + $0x48] sm:$0xff]   ;;  %v753_v44 = vld [vmem:[%s964_s4 + $0x80] sm:$0xff]   ;;  %p757_p0 = scmp.ne.s32.totalorder %s586_s19, %s756_s20  ;;  %p762_p2 = scmp.lt.s32.totalorder %s756_s20, %s756_s20 }
  0x20   :  { %652 = vmatprep.subr.bf16.mxu0 %v745_v36  ;;  %v752_v43 = vld [vmem:[%s964_s4 + $0x8] sm:$0xff]   ;;  %v754_v45 = vld [vmem:[%s964_s4 + $0x40] sm:$0xff]  }
  0x21   :  { %v755_v46 = vld [vmem:[%s964_s4] sm:$0xff]   ;;  %p763_p3 = por %p762_p2, %p761_p1 }
  0x22   :  { %700 = vmatpush3.bf16.msra.mxu1 %v744_v35  ;;  %v613_v12 = vld [vmem:[%s965_s5] ss:$0 sm:$0xff] }
  0x23   :  { %701 = vmatprep.subr.bf16.mxu1 %v778_v1  ;;  %653 = vmatpush3.bf16.msra.mxu0 %v746_v37  ;;  %p764_p4 = pnand %p763_p3, %p757_p0 }
  0x24   :  { %654 = vmatprep.subr.bf16.mxu0 %v748_v39 }
  0x26   :  { %702 = vmatpush3.bf16.msra.mxu1 %v747_v38 }
  0x27   :  { %703 = vmatprep.subr.bf16.mxu1 %v778_v1  ;;  %655 = vmatpush3.bf16.msra.mxu0 %v749_v40 }
  0x28   :  { %656 = vmatprep.subr.bf16.mxu0 %v751_v42 }
  0x2a   :  { %704 = vmatpush3.bf16.msra.mxu1 %v750_v41 }
  0x2b   :  { %705 = vmatprep.subr.bf16.mxu1 %v778_v1  ;;  %657 = vmatpush3.bf16.msra.mxu0 %v752_v43 }
  0x2c   :  { %658 = vmatprep.subr.bf16.mxu0 %v754_v45 }
  0x2e   :  { %706 = vmatpush3.bf16.msra.mxu1 %v753_v44 }
  0x2f   :  { %659 = vmatpush3.bf16.msra.mxu0 %v755_v46 }
  0xc9   :  { %v151_v47 = vpop.f32.mrf.mxu1 }
  0xca   :  { %v108_v48 = vpop.f32.mrf.mxu0 }
  0xcb   :  { %v681_v49 = vpop.f32.mrf.mxu1 }
  0xcc   :  { %v110_v50 = vpop.f32.mrf.mxu0 }
  0xcd   :  { %v154_v51 = vpop.f32.mrf.mxu1 }
  0xce   :  { %v112_v52 = vpop.f32.mrf.mxu0 }
  0xcf   :  { %v682_v53 = vpop.f32.mrf.mxu1 }
  0xd0   :  { %v114_v54 = vpop.f32.mrf.mxu0 }
  0xd1   :  { %v280_v55 = vpop.f32.mrf.mxu1 }
  0xd2   :  { %v237_v56 = vpop.f32.mrf.mxu0  ;;  %v289_v60 = vmul.f32 %v280_v55, %v151_v47 }
  0xd3   :  { %v689_v57 = vpop.f32.mrf.mxu1  ;;  %v287_v5 = vmul.f32 %v237_v56, %v108_v48 }
  0xd4   :  { %v239_v58 = vpop.f32.mrf.mxu0 }
  0xd5   :  { %v283_v59 = vpop.f32.mrf.mxu1  ;;  %v288_v3 = vmul.f32 %v239_v58, %v110_v50 }
  0xd6   :  { %v292_v61 = vmul.f32 %v283_v59, %v154_v51  ;;  %v241_v62 = vpop.f32.mrf.mxu0 }
  0xd7   :  { %v690_v63 = vpop.f32.mrf.mxu1  ;;  %v290_v1 = vmul.f32 %v241_v62, %v112_v52 }
  0xd8   :  { %v295_v0 = vpack.c.bf16 %v292_v61, %v289_v60  ;;  %v243_v2 = vpop.f32.mrf.mxu0 }
  0xd9   :  { %v291_v4 = vmul.f32 %v243_v2, %v114_v54  ;;  %v293_v7 = vpack.c.bf16 %v290_v1, %v287_v5 }
  0xda   :  { %708 = vmatmul.mubr.bf16.vlgmr.msra.gmra.mxu1 %v295_v0 }
  0xdb   :  { %v294_v6 = vpack.c.bf16 %v291_v4, %v288_v3 }
  0xdd   :  { %527 = vmatprep.mubr.bf16.mxu0 %v294_v6 }
  0xde   :  { %528 = vmatmul.mubr.bf16.vlgmr.msra.gmra.mxu0 %v293_v7 }
 0x19a   :  { %v570_v8 = vpop.f32.mrf.mxu1 }
 0x19c   :  { %v709_v9 = vpop.f32.mrf.mxu1 }
 0x19e   :  { %v660_v10 = vpop.f32.mrf.mxu0  ;;  %v573_v11 = vpop.f32.mrf.mxu1 }
 0x1a0   :  { %v661_v13 = vpop.f32.mrf.mxu0  ;;  %v710_v14 = vpop.f32.mrf.mxu1 }
 0x1a1   :  { %v662_v15 = vadd.f32 %v661_v13, %v660_v10 }
 0x1a2   :  { %v663_v16 = vpop.f32.mrf.mxu0 }
 0x1a3   :  { %v530_v17 = vadd.f32 %v662_v15, %v613_v12 }
 0x1a4   :  { %v664_v18 = vpop.f32.mrf.mxu0 }
 0x1a5   :  { %v571_v19 = vadd.f32 %v570_v8, %v530_v17  ;;  %v665_v20 = vadd.f32 %v664_v18, %v663_v16 }
 0x1a7   :  { %578 = vst.msk [vmem:[#allocation2] sm:$0xff] %vm577_vm4, %v571_v19  ;;  %v533_v21 = vadd.f32 %v665_v20, %v613_v12 }
 0x1a9   :  { %v574_v22 = vadd.f32 %v573_v11, %v533_v21 }
 0x1ab   :  { %579 = vst.msk [vmem:[#allocation2 + $0x8] sm:$0xff] %vm577_vm4, %v574_v22 }
 0x1ac   :  { %767 = shalt.err (!%p764_p4)
}
 0x1ad   :  { %s782_s5 = smov 128   ;;  %s783_s21 = smov 8  }
 0x1ae   :  { %591 = dma.vmem_to_hbm [thread:$0]  %s586_s19, 256, %s966_s6, [#allocation3], %s782_s5, %s782_s5, %s783_s21  }
 0x1af   :  { %776 = dma.done.wait [#allocation3], 256  }
 0x1b0   :  { %777 = vsyncadd [#allocation3], 4294967040 }
 0x1b1   :  { %595 = vsyncpa [#allocation3], 1 }

</bundles_post_ra>
